<compile_context>
chip_gen: v7x
topology: tpu7x:2x2x1
jax: 0.10.0
libtpu: 0.0.40
codegen_flags: <defaults>
</compile_context>

<pallas_src>
import functools

import jax
import jax.numpy as jnp
from jax import lax
from jax.experimental import pallas as pl
from jax.experimental.pallas import tpu as pltpu  # noqa: F401


# ----------------------------------------------------------------------------
# Fused kernel: the whole (batch, heads) problem in a single invocation.
# ----------------------------------------------------------------------------
def fused_mha_kernel(x_ref, w_heads_ref, b_heads_ref, wout_ref, bout_ref,
                     fc_ref, o_ref, *, batch, seq, num_heads):
    """Single-invocation fused multi-head attention.

    x_ref       : (B*T, E)     all batch rows stacked
    w_heads_ref : (3*H, E, hd) per-head projection weights [q heads|k heads|v heads]
                               (Q block pre-scaled by 1/sqrt(hd) at prep time)
    b_heads_ref : (3*H, 1, hd) matching biases (Q block pre-scaled)
    wout_ref    : (H, hd, E)   per-head row-blocks of the output projection
    bout_ref    : (1, E)       output-projection bias
    fc_ref      : (T, T)       0.7 * fc_matrix (pre-folded at prep time)
    o_ref       : (B*T, E)
    """
    H = num_heads
    T = seq
    x = x_ref[...]                       # (B*T, E)
    fc = fc_ref[...]                     # (T, T)
    bout = bout_ref[...]                 # (1, E)

    acc = [None] * batch                 # per-batch f32 output accumulators
    for h in range(H):
        # Per-head projections as clean leading-axis weight blocks — no 8-lane
        # sub-slices of a wide qkv activation anywhere on the critical path.
        q = jnp.dot(x, w_heads_ref[h], preferred_element_type=jnp.float32) \
            + b_heads_ref[h]                                             # (B*T, hd)
        k = jnp.dot(x, w_heads_ref[H + h], preferred_element_type=jnp.float32) \
            + b_heads_ref[H + h]
        v = jnp.dot(x, w_heads_ref[2 * H + h], preferred_element_type=jnp.float32) \
            + b_heads_ref[2 * H + h]

        for b in range(batch):
            lo = b * T
            qb = q[lo:lo + T, :]         # (T, hd) — sublane-aligned row slab
            kb = k[lo:lo + T, :]
            vb = v[lo:lo + T, :]

            # q @ k^T without materializing a transpose: contract both last dims.
            s = lax.dot_general(qb, kb, (((1,), (1,)), ((), ())),
                                preferred_element_type=jnp.float32)      # (T, T)
            s = s + fc                   # fc already carries the 0.7 factor

            m = jnp.max(s, axis=-1, keepdims=True)
            p = jnp.exp(s - m)
            denom = jnp.sum(p, axis=-1, keepdims=True)
            # EUP approximate reciprocal + one Newton step: full f32 accuracy,
            # no VALU divide chain (denom >= 1 by construction).
            r = pl.reciprocal(denom, approx=True)
            r = r * (2.0 - denom * r)
            attn = p * r
            # TODO(synk): training-mode nn.Dropout(p=0.1) on attn weights omitted
            # (eval-mode semantics = identity).

            head_out = jnp.dot(attn, vb, preferred_element_type=jnp.float32)   # (T, hd)
            # Fused head concat: accumulate directly through the output projection.
            contrib = jnp.dot(head_out, wout_ref[h],
                              preferred_element_type=jnp.float32)               # (T, E)
            acc[b] = contrib if acc[b] is None else acc[b] + contrib

    for b in range(batch):
        lo = b * T
        o_ref[lo:lo + T, :] = (acc[b] + bout).astype(o_ref.dtype)


# ----------------------------------------------------------------------------
# One-time parameter prep (outside the per-call hot path).
# ----------------------------------------------------------------------------
def prepare_params(params, fc_matrix, num_heads):
    E = params["w_out"].shape[0]
    H = num_heads
    hd = E // H
    scale = 1.0 / (hd ** 0.5)

    w_qkv = params["w_qkv"]              # (E, 3E), columns [q | k | v], head-major
    b_qkv = params["b_qkv"]              # (3E,)

    def split_w(w):                      # (E, E) -> (H, E, hd)
        return w.reshape(E, H, hd).transpose(1, 0, 2)

    def split_b(b):                      # (E,) -> (H, 1, hd)
        return b.reshape(H, 1, hd)

    wq, wk, wv = w_qkv[:, :E], w_qkv[:, E:2 * E], w_qkv[:, 2 * E:]
    bq, bk, bv = b_qkv[:E], b_qkv[E:2 * E], b_qkv[2 * E:]

    # Fold the 1/sqrt(hd) scale into the Q weights/bias ONLY.
    w_stack = jnp.concatenate(
        [split_w(wq * scale), split_w(wk), split_w(wv)], axis=0)   # (3H, E, hd)
    b_stack = jnp.concatenate(
        [split_b(bq * scale), split_b(bk), split_b(bv)], axis=0)   # (3H, 1, hd)

    return {
        "num_heads": H,
        "w_heads": w_stack,
        "b_heads": b_stack,
        "wout_heads": params["w_out"].reshape(H, hd, E),            # (H, hd, E)
        "bout": params["b_out"].reshape(1, E),
        "fc07": fc_matrix * 0.7,
    }


# ----------------------------------------------------------------------------
# Forward pass: a single (grid-less) pallas_call; only metadata reshapes outside.
# ----------------------------------------------------------------------------
def custom_mha_forward(x, prep):
    B, T, E = x.shape
    x2d = x.reshape(B * T, E)            # layout-preserving collapse of (B, T)

    kern = functools.partial(fused_mha_kernel, batch=B, seq=T,
                             num_heads=prep["num_heads"])

    out2d = pl.pallas_call(
        kern,
        out_shape=jax.ShapeDtypeStruct((B * T, E), jnp.float32),
        # No grid: the whole problem (a few KiB) runs in one invocation with all
        # operands VMEM-resident — grid steps / megacore sharding would be pure
        # per-step overhead at these shapes.
        # TODO(synk): if T grows past ~2K, switch to a KV-tiled (flash-style)
        # grid with fc streamed as (tq, tk) blocks and raise vmem_limit_bytes.
    )(x2d, prep["w_heads"], prep["b_heads"], prep["wout_heads"],
      prep["bout"], prep["fc07"])

    return out2d.reshape(B, T, E)


if __name__ == "__main__":
    B, T, E, H = 2, 8, 32, 4
    hd = E // H

    key = jax.random.PRNGKey(0)
    k1, k2, k3, k4, k5, k6 = jax.random.split(key, 6)

    x = jax.random.normal(k1, (B, T, E), jnp.float32)

    # Deterministic parameter init (shapes from nn.Linear(E, 3E) / nn.Linear(E, E)).
    bound = 1.0 / (E ** 0.5)
    params = {
        "w_qkv": jax.random.uniform(k2, (E, 3 * E), jnp.float32, -bound, bound),
        "b_qkv": jax.random.uniform(k3, (3 * E,), jnp.float32, -bound, bound),
        "w_out": jax.random.uniform(k4, (E, E), jnp.float32, -bound, bound),
        "b_out": jax.random.uniform(k5, (E,), jnp.float32, -bound, bound),
    }

    # Stand-in for np.load(fc_matrix_path): deterministic (T, T) connectivity bias.
    fc_matrix = jax.random.normal(k6, (T, T), jnp.float32)

    prep = prepare_params(params, fc_matrix, H)   # one-time, outside the hot path
    out = custom_mha_forward(x, prep)
    jax.block_until_ready(out)

    # Pure-JAX reference (eval-mode dropout) for a correctness check.
    def ref(x):
        qkv = x @ params["w_qkv"] + params["b_qkv"]
        q, k, v = jnp.split(qkv, 3, axis=-1)

        def heads(t):
            return t.reshape(B, T, H, hd).transpose(0, 2, 1, 3)

        q, k, v = heads(q), heads(k), heads(v)
        s = jnp.einsum("bhqd,bhkd->bhqk", q, k) / (hd ** 0.5)
        s = s + 0.7 * fc_matrix[None, None]
        w = jax.nn.softmax(s, axis=-1)
        o = jnp.einsum("bhqk,bhkd->bhqd", w, v).transpose(0, 2, 1, 3).reshape(B, T, E)
        return o @ params["w_out"] + params["b_out"]

    expected = ref(x)
    assert jnp.allclose(out, expected, atol=1e-4, rtol=1e-4), "mismatch vs reference"
    print("KERNEL_OK")
</pallas_src>

<mosaic_0001>
module attributes {stable_mosaic.version = 11 : i64} {
  func.func @fused_mha_kernel(%arg0: memref<16x32xf32, #tpu.memory_space<vmem>>, %arg1: memref<12x32x8xf32, #tpu.memory_space<vmem>>, %arg2: memref<12x1x8xf32, #tpu.memory_space<vmem>>, %arg3: memref<4x8x32xf32, #tpu.memory_space<vmem>>, %arg4: memref<1x32xf32, #tpu.memory_space<vmem>>, %arg5: memref<8x8xf32, #tpu.memory_space<vmem>>, %arg6: memref<16x32xf32, #tpu.memory_space<vmem>>) attributes {dimension_semantics = [], scalar_prefetch = 0 : i64, scratch_operands = 0 : i64, tpu.core_type = #tpu.core_type<tc>} {
    %c0 = arith.constant 0 : index
    %c0_0 = arith.constant 0 : index
    %0 = vector.load %arg0[%c0, %c0_0] : memref<16x32xf32, #tpu.memory_space<vmem>>, vector<16x32xf32>
    %c0_1 = arith.constant 0 : index
    %c0_2 = arith.constant 0 : index
    %1 = vector.load %arg5[%c0_1, %c0_2] : memref<8x8xf32, #tpu.memory_space<vmem>>, vector<8x8xf32>
    %c0_3 = arith.constant 0 : index
    %c0_4 = arith.constant 0 : index
    %2 = vector.load %arg4[%c0_3, %c0_4] : memref<1x32xf32, #tpu.memory_space<vmem>>, vector<1x32xf32>
    %c0_5 = arith.constant 0 : index
    %c0_6 = arith.constant 0 : index
    %c0_7 = arith.constant 0 : index
    %3 = vector.load %arg1[%c0_5, %c0_6, %c0_7] : memref<12x32x8xf32, #tpu.memory_space<vmem>>, vector<1x32x8xf32>
    %4 = vector.shape_cast %3 : vector<1x32x8xf32> to vector<32x8xf32>
    %cst = arith.constant dense<0.000000e+00> : vector<16x8xf32>
    %5 = tpu.matmul %0, %4, %cst {dimension_numbers = #tpu.dot_dimension_numbers<[1], [0], [0], [1], [0, 0, 1, 1], [], []>} : vector<16x32xf32>, vector<32x8xf32>, vector<16x8xf32> -> vector<16x8xf32>
    %c0_8 = arith.constant 0 : index
    %c0_9 = arith.constant 0 : index
    %c0_10 = arith.constant 0 : index
    %6 = vector.load %arg2[%c0_8, %c0_9, %c0_10] : memref<12x1x8xf32, #tpu.memory_space<vmem>>, vector<1x1x8xf32>
    %7 = vector.shape_cast %6 : vector<1x1x8xf32> to vector<1x8xf32>
    %8 = vector.broadcast %7 : vector<1x8xf32> to vector<16x8xf32>
    %9 = arith.addf %5, %8 : vector<16x8xf32>
    %c4 = arith.constant 4 : index
    %c0_11 = arith.constant 0 : index
    %c0_12 = arith.constant 0 : index
    %10 = vector.load %arg1[%c4, %c0_11, %c0_12] : memref<12x32x8xf32, #tpu.memory_space<vmem>>, vector<1x32x8xf32>
    %11 = vector.shape_cast %10 : vector<1x32x8xf32> to vector<32x8xf32>
    %cst_13 = arith.constant dense<0.000000e+00> : vector<16x8xf32>
    %12 = tpu.matmul %0, %11, %cst_13 {dimension_numbers = #tpu.dot_dimension_numbers<[1], [0], [0], [1], [0, 0, 1, 1], [], []>} : vector<16x32xf32>, vector<32x8xf32>, vector<16x8xf32> -> vector<16x8xf32>
    %c4_14 = arith.constant 4 : index
    %c0_15 = arith.constant 0 : index
    %c0_16 = arith.constant 0 : index
    %13 = vector.load %arg2[%c4_14, %c0_15, %c0_16] : memref<12x1x8xf32, #tpu.memory_space<vmem>>, vector<1x1x8xf32>
    %14 = vector.shape_cast %13 : vector<1x1x8xf32> to vector<1x8xf32>
    %15 = vector.broadcast %14 : vector<1x8xf32> to vector<16x8xf32>
    %16 = arith.addf %12, %15 : vector<16x8xf32>
    %c8 = arith.constant 8 : index
    %c0_17 = arith.constant 0 : index
    %c0_18 = arith.constant 0 : index
    %17 = vector.load %arg1[%c8, %c0_17, %c0_18] : memref<12x32x8xf32, #tpu.memory_space<vmem>>, vector<1x32x8xf32>
    %18 = vector.shape_cast %17 : vector<1x32x8xf32> to vector<32x8xf32>
    %cst_19 = arith.constant dense<0.000000e+00> : vector<16x8xf32>
    %19 = tpu.matmul %0, %18, %cst_19 {dimension_numbers = #tpu.dot_dimension_numbers<[1], [0], [0], [1], [0, 0, 1, 1], [], []>} : vector<16x32xf32>, vector<32x8xf32>, vector<16x8xf32> -> vector<16x8xf32>
    %c8_20 = arith.constant 8 : index
    %c0_21 = arith.constant 0 : index
    %c0_22 = arith.constant 0 : index
    %20 = vector.load %arg2[%c8_20, %c0_21, %c0_22] : memref<12x1x8xf32, #tpu.memory_space<vmem>>, vector<1x1x8xf32>
    %21 = vector.shape_cast %20 : vector<1x1x8xf32> to vector<1x8xf32>
    %22 = vector.broadcast %21 : vector<1x8xf32> to vector<16x8xf32>
    %23 = arith.addf %19, %22 : vector<16x8xf32>
    %24 = vector.extract_strided_slice %9 {offsets = [0, 0], sizes = [8, 8], strides = [1, 1]} : vector<16x8xf32> to vector<8x8xf32>
    %25 = vector.extract_strided_slice %16 {offsets = [0, 0], sizes = [8, 8], strides = [1, 1]} : vector<16x8xf32> to vector<8x8xf32>
    %26 = vector.extract_strided_slice %23 {offsets = [0, 0], sizes = [8, 8], strides = [1, 1]} : vector<16x8xf32> to vector<8x8xf32>
    %cst_23 = arith.constant dense<0.000000e+00> : vector<8x8xf32>
    %27 = tpu.matmul %24, %25, %cst_23 {dimension_numbers = #tpu.dot_dimension_numbers<[1], [1], [0], [0], [0, 0, 1, 0], [], []>} : vector<8x8xf32>, vector<8x8xf32>, vector<8x8xf32> -> vector<8x8xf32>
    %28 = arith.addf %27, %1 : vector<8x8xf32>
    %cst_24 = arith.constant dense<0xFF800000> : vector<8xf32>
    %29 = vector.multi_reduction <maximumf>, %28, %cst_24 [1] : vector<8x8xf32> to vector<8xf32>
    %30 = vector.shape_cast %29 : vector<8xf32> to vector<8x1xf32>
    %31 = vector.broadcast %30 : vector<8x1xf32> to vector<8x8xf32>
    %32 = arith.subf %28, %31 : vector<8x8xf32>
    %33 = math.exp %32 : vector<8x8xf32>
    %cst_25 = arith.constant dense<0.000000e+00> : vector<8xf32>
    %34 = vector.multi_reduction <add>, %33, %cst_25 [1] : vector<8x8xf32> to vector<8xf32>
    %35 = vector.shape_cast %34 : vector<8xf32> to vector<8x1xf32>
    %36 = tpu.reciprocal %35 {approx = true} : vector<8x1xf32> -> vector<8x1xf32>
    %37 = arith.mulf %35, %36 : vector<8x1xf32>
    %cst_26 = arith.constant 2.000000e+00 : f32
    %38 = vector.broadcast %cst_26 : f32 to vector<8x1xf32>
    %39 = arith.subf %38, %37 : vector<8x1xf32>
    %40 = arith.mulf %36, %39 : vector<8x1xf32>
    %41 = vector.broadcast %40 : vector<8x1xf32> to vector<8x8xf32>
    %42 = arith.mulf %33, %41 : vector<8x8xf32>
    %cst_27 = arith.constant dense<0.000000e+00> : vector<8x8xf32>
    %43 = tpu.matmul %42, %26, %cst_27 {dimension_numbers = #tpu.dot_dimension_numbers<[1], [0], [0], [1], [0, 0, 1, 1], [], []>} : vector<8x8xf32>, vector<8x8xf32>, vector<8x8xf32> -> vector<8x8xf32>
    %c0_28 = arith.constant 0 : index
    %c0_29 = arith.constant 0 : index
    %c0_30 = arith.constant 0 : index
    %44 = vector.load %arg3[%c0_28, %c0_29, %c0_30] : memref<4x8x32xf32, #tpu.memory_space<vmem>>, vector<1x8x32xf32>
    %45 = vector.shape_cast %44 : vector<1x8x32xf32> to vector<8x32xf32>
    %cst_31 = arith.constant dense<0.000000e+00> : vector<8x32xf32>
    %46 = tpu.matmul %43, %45, %cst_31 {dimension_numbers = #tpu.dot_dimension_numbers<[1], [0], [0], [1], [0, 0, 1, 1], [], []>} : vector<8x8xf32>, vector<8x32xf32>, vector<8x32xf32> -> vector<8x32xf32>
    %47 = vector.extract_strided_slice %9 {offsets = [8, 0], sizes = [8, 8], strides = [1, 1]} : vector<16x8xf32> to vector<8x8xf32>
    %48 = vector.extract_strided_slice %16 {offsets = [8, 0], sizes = [8, 8], strides = [1, 1]} : vector<16x8xf32> to vector<8x8xf32>
    %49 = vector.extract_strided_slice %23 {offsets = [8, 0], sizes = [8, 8], strides = [1, 1]} : vector<16x8xf32> to vector<8x8xf32>
    %cst_32 = arith.constant dense<0.000000e+00> : vector<8x8xf32>
    %50 = tpu.matmul %47, %48, %cst_32 {dimension_numbers = #tpu.dot_dimension_numbers<[1], [1], [0], [0], [0, 0, 1, 0], [], []>} : vector<8x8xf32>, vector<8x8xf32>, vector<8x8xf32> -> vector<8x8xf32>
    %51 = arith.addf %50, %1 : vector<8x8xf32>
    %cst_33 = arith.constant dense<0xFF800000> : vector<8xf32>
    %52 = vector.multi_reduction <maximumf>, %51, %cst_33 [1] : vector<8x8xf32> to vector<8xf32>
    %53 = vector.shape_cast %52 : vector<8xf32> to vector<8x1xf32>
    %54 = vector.broadcast %53 : vector<8x1xf32> to vector<8x8xf32>
    %55 = arith.subf %51, %54 : vector<8x8xf32>
    %56 = math.exp %55 : vector<8x8xf32>
    %cst_34 = arith.constant dense<0.000000e+00> : vector<8xf32>
    %57 = vector.multi_reduction <add>, %56, %cst_34 [1] : vector<8x8xf32> to vector<8xf32>
    %58 = vector.shape_cast %57 : vector<8xf32> to vector<8x1xf32>
    %59 = tpu.reciprocal %58 {approx = true} : vector<8x1xf32> -> vector<8x1xf32>
    %60 = arith.mulf %58, %59 : vector<8x1xf32>
    %cst_35 = arith.constant 2.000000e+00 : f32
    %61 = vector.broadcast %cst_35 : f32 to vector<8x1xf32>
    %62 = arith.subf %61, %60 : vector<8x1xf32>
    %63 = arith.mulf %59, %62 : vector<8x1xf32>
    %64 = vector.broadcast %63 : vector<8x1xf32> to vector<8x8xf32>
    %65 = arith.mulf %56, %64 : vector<8x8xf32>
    %cst_36 = arith.constant dense<0.000000e+00> : vector<8x8xf32>
    %66 = tpu.matmul %65, %49, %cst_36 {dimension_numbers = #tpu.dot_dimension_numbers<[1], [0], [0], [1], [0, 0, 1, 1], [], []>} : vector<8x8xf32>, vector<8x8xf32>, vector<8x8xf32> -> vector<8x8xf32>
    %c0_37 = arith.constant 0 : index
    %c0_38 = arith.constant 0 : index
    %c0_39 = arith.constant 0 : index
    %67 = vector.load %arg3[%c0_37, %c0_38, %c0_39] : memref<4x8x32xf32, #tpu.memory_space<vmem>>, vector<1x8x32xf32>
    %68 = vector.shape_cast %67 : vector<1x8x32xf32> to vector<8x32xf32>
    %cst_40 = arith.constant dense<0.000000e+00> : vector<8x32xf32>
    %69 = tpu.matmul %66, %68, %cst_40 {dimension_numbers = #tpu.dot_dimension_numbers<[1], [0], [0], [1], [0, 0, 1, 1], [], []>} : vector<8x8xf32>, vector<8x32xf32>, vector<8x32xf32> -> vector<8x32xf32>
    %c1 = arith.constant 1 : index
    %c0_41 = arith.constant 0 : index
    %c0_42 = arith.constant 0 : index
    %70 = vector.load %arg1[%c1, %c0_41, %c0_42] : memref<12x32x8xf32, #tpu.memory_space<vmem>>, vector<1x32x8xf32>
    %71 = vector.shape_cast %70 : vector<1x32x8xf32> to vector<32x8xf32>
    %cst_43 = arith.constant dense<0.000000e+00> : vector<16x8xf32>
    %72 = tpu.matmul %0, %71, %cst_43 {dimension_numbers = #tpu.dot_dimension_numbers<[1], [0], [0], [1], [0, 0, 1, 1], [], []>} : vector<16x32xf32>, vector<32x8xf32>, vector<16x8xf32> -> vector<16x8xf32>
    %c1_44 = arith.constant 1 : index
    %c0_45 = arith.constant 0 : index
    %c0_46 = arith.constant 0 : index
    %73 = vector.load %arg2[%c1_44, %c0_45, %c0_46] : memref<12x1x8xf32, #tpu.memory_space<vmem>>, vector<1x1x8xf32>
    %74 = vector.shape_cast %73 : vector<1x1x8xf32> to vector<1x8xf32>
    %75 = vector.broadcast %74 : vector<1x8xf32> to vector<16x8xf32>
    %76 = arith.addf %72, %75 : vector<16x8xf32>
    %c5 = arith.constant 5 : index
    %c0_47 = arith.constant 0 : index
    %c0_48 = arith.constant 0 : index
    %77 = vector.load %arg1[%c5, %c0_47, %c0_48] : memref<12x32x8xf32, #tpu.memory_space<vmem>>, vector<1x32x8xf32>
    %78 = vector.shape_cast %77 : vector<1x32x8xf32> to vector<32x8xf32>
    %cst_49 = arith.constant dense<0.000000e+00> : vector<16x8xf32>
    %79 = tpu.matmul %0, %78, %cst_49 {dimension_numbers = #tpu.dot_dimension_numbers<[1], [0], [0], [1], [0, 0, 1, 1], [], []>} : vector<16x32xf32>, vector<32x8xf32>, vector<16x8xf32> -> vector<16x8xf32>
    %c5_50 = arith.constant 5 : index
    %c0_51 = arith.constant 0 : index
    %c0_52 = arith.constant 0 : index
    %80 = vector.load %arg2[%c5_50, %c0_51, %c0_52] : memref<12x1x8xf32, #tpu.memory_space<vmem>>, vector<1x1x8xf32>
    %81 = vector.shape_cast %80 : vector<1x1x8xf32> to vector<1x8xf32>
    %82 = vector.broadcast %81 : vector<1x8xf32> to vector<16x8xf32>
    %83 = arith.addf %79, %82 : vector<16x8xf32>
    %c9 = arith.constant 9 : index
    %c0_53 = arith.constant 0 : index
    %c0_54 = arith.constant 0 : index
    %84 = vector.load %arg1[%c9, %c0_53, %c0_54] : memref<12x32x8xf32, #tpu.memory_space<vmem>>, vector<1x32x8xf32>
    %85 = vector.shape_cast %84 : vector<1x32x8xf32> to vector<32x8xf32>
    %cst_55 = arith.constant dense<0.000000e+00> : vector<16x8xf32>
    %86 = tpu.matmul %0, %85, %cst_55 {dimension_numbers = #tpu.dot_dimension_numbers<[1], [0], [0], [1], [0, 0, 1, 1], [], []>} : vector<16x32xf32>, vector<32x8xf32>, vector<16x8xf32> -> vector<16x8xf32>
    %c9_56 = arith.constant 9 : index
    %c0_57 = arith.constant 0 : index
    %c0_58 = arith.constant 0 : index
    %87 = vector.load %arg2[%c9_56, %c0_57, %c0_58] : memref<12x1x8xf32, #tpu.memory_space<vmem>>, vector<1x1x8xf32>
    %88 = vector.shape_cast %87 : vector<1x1x8xf32> to vector<1x8xf32>
    %89 = vector.broadcast %88 : vector<1x8xf32> to vector<16x8xf32>
    %90 = arith.addf %86, %89 : vector<16x8xf32>
    %91 = vector.extract_strided_slice %76 {offsets = [0, 0], sizes = [8, 8], strides = [1, 1]} : vector<16x8xf32> to vector<8x8xf32>
    %92 = vector.extract_strided_slice %83 {offsets = [0, 0], sizes = [8, 8], strides = [1, 1]} : vector<16x8xf32> to vector<8x8xf32>
    %93 = vector.extract_strided_slice %90 {offsets = [0, 0], sizes = [8, 8], strides = [1, 1]} : vector<16x8xf32> to vector<8x8xf32>
    %cst_59 = arith.constant dense<0.000000e+00> : vector<8x8xf32>
    %94 = tpu.matmul %91, %92, %cst_59 {dimension_numbers = #tpu.dot_dimension_numbers<[1], [1], [0], [0], [0, 0, 1, 0], [], []>} : vector<8x8xf32>, vector<8x8xf32>, vector<8x8xf32> -> vector<8x8xf32>
    %95 = arith.addf %94, %1 : vector<8x8xf32>
    %cst_60 = arith.constant dense<0xFF800000> : vector<8xf32>
    %96 = vector.multi_reduction <maximumf>, %95, %cst_60 [1] : vector<8x8xf32> to vector<8xf32>
    %97 = vector.shape_cast %96 : vector<8xf32> to vector<8x1xf32>
    %98 = vector.broadcast %97 : vector<8x1xf32> to vector<8x8xf32>
    %99 = arith.subf %95, %98 : vector<8x8xf32>
    %100 = math.exp %99 : vector<8x8xf32>
    %cst_61 = arith.constant dense<0.000000e+00> : vector<8xf32>
    %101 = vector.multi_reduction <add>, %100, %cst_61 [1] : vector<8x8xf32> to vector<8xf32>
    %102 = vector.shape_cast %101 : vector<8xf32> to vector<8x1xf32>
    %103 = tpu.reciprocal %102 {approx = true} : vector<8x1xf32> -> vector<8x1xf32>
    %104 = arith.mulf %102, %103 : vector<8x1xf32>
    %cst_62 = arith.constant 2.000000e+00 : f32
    %105 = vector.broadcast %cst_62 : f32 to vector<8x1xf32>
    %106 = arith.subf %105, %104 : vector<8x1xf32>
    %107 = arith.mulf %103, %106 : vector<8x1xf32>
    %108 = vector.broadcast %107 : vector<8x1xf32> to vector<8x8xf32>
    %109 = arith.mulf %100, %108 : vector<8x8xf32>
    %cst_63 = arith.constant dense<0.000000e+00> : vector<8x8xf32>
    %110 = tpu.matmul %109, %93, %cst_63 {dimension_numbers = #tpu.dot_dimension_numbers<[1], [0], [0], [1], [0, 0, 1, 1], [], []>} : vector<8x8xf32>, vector<8x8xf32>, vector<8x8xf32> -> vector<8x8xf32>
    %c1_64 = arith.constant 1 : index
    %c0_65 = arith.constant 0 : index
    %c0_66 = arith.constant 0 : index
    %111 = vector.load %arg3[%c1_64, %c0_65, %c0_66] : memref<4x8x32xf32, #tpu.memory_space<vmem>>, vector<1x8x32xf32>
    %112 = vector.shape_cast %111 : vector<1x8x32xf32> to vector<8x32xf32>
    %cst_67 = arith.constant dense<0.000000e+00> : vector<8x32xf32>
    %113 = tpu.matmul %110, %112, %cst_67 {dimension_numbers = #tpu.dot_dimension_numbers<[1], [0], [0], [1], [0, 0, 1, 1], [], []>} : vector<8x8xf32>, vector<8x32xf32>, vector<8x32xf32> -> vector<8x32xf32>
    %114 = arith.addf %46, %113 : vector<8x32xf32>
    %115 = vector.extract_strided_slice %76 {offsets = [8, 0], sizes = [8, 8], strides = [1, 1]} : vector<16x8xf32> to vector<8x8xf32>
    %116 = vector.extract_strided_slice %83 {offsets = [8, 0], sizes = [8, 8], strides = [1, 1]} : vector<16x8xf32> to vector<8x8xf32>
    %117 = vector.extract_strided_slice %90 {offsets = [8, 0], sizes = [8, 8], strides = [1, 1]} : vector<16x8xf32> to vector<8x8xf32>
    %cst_68 = arith.constant dense<0.000000e+00> : vector<8x8xf32>
    %118 = tpu.matmul %115, %116, %cst_68 {dimension_numbers = #tpu.dot_dimension_numbers<[1], [1], [0], [0], [0, 0, 1, 0], [], []>} : vector<8x8xf32>, vector<8x8xf32>, vector<8x8xf32> -> vector<8x8xf32>
    %119 = arith.addf %118, %1 : vector<8x8xf32>
    %cst_69 = arith.constant dense<0xFF800000> : vector<8xf32>
    %120 = vector.multi_reduction <maximumf>, %119, %cst_69 [1] : vector<8x8xf32> to vector<8xf32>
    %121 = vector.shape_cast %120 : vector<8xf32> to vector<8x1xf32>
    %122 = vector.broadcast %121 : vector<8x1xf32> to vector<8x8xf32>
    %123 = arith.subf %119, %122 : vector<8x8xf32>
    %124 = math.exp %123 : vector<8x8xf32>
    %cst_70 = arith.constant dense<0.000000e+00> : vector<8xf32>
    %125 = vector.multi_reduction <add>, %124, %cst_70 [1] : vector<8x8xf32> to vector<8xf32>
    %126 = vector.shape_cast %125 : vector<8xf32> to vector<8x1xf32>
    %127 = tpu.reciprocal %126 {approx = true} : vector<8x1xf32> -> vector<8x1xf32>
    %128 = arith.mulf %126, %127 : vector<8x1xf32>
    %cst_71 = arith.constant 2.000000e+00 : f32
    %129 = vector.broadcast %cst_71 : f32 to vector<8x1xf32>
    %130 = arith.subf %129, %128 : vector<8x1xf32>
    %131 = arith.mulf %127, %130 : vector<8x1xf32>
    %132 = vector.broadcast %131 : vector<8x1xf32> to vector<8x8xf32>
    %133 = arith.mulf %124, %132 : vector<8x8xf32>
    %cst_72 = arith.constant dense<0.000000e+00> : vector<8x8xf32>
    %134 = tpu.matmul %133, %117, %cst_72 {dimension_numbers = #tpu.dot_dimension_numbers<[1], [0], [0], [1], [0, 0, 1, 1], [], []>} : vector<8x8xf32>, vector<8x8xf32>, vector<8x8xf32> -> vector<8x8xf32>
    %c1_73 = arith.constant 1 : index
    %c0_74 = arith.constant 0 : index
    %c0_75 = arith.constant 0 : index
    %135 = vector.load %arg3[%c1_73, %c0_74, %c0_75] : memref<4x8x32xf32, #tpu.memory_space<vmem>>, vector<1x8x32xf32>
    %136 = vector.shape_cast %135 : vector<1x8x32xf32> to vector<8x32xf32>
    %cst_76 = arith.constant dense<0.000000e+00> : vector<8x32xf32>
    %137 = tpu.matmul %134, %136, %cst_76 {dimension_numbers = #tpu.dot_dimension_numbers<[1], [0], [0], [1], [0, 0, 1, 1], [], []>} : vector<8x8xf32>, vector<8x32xf32>, vector<8x32xf32> -> vector<8x32xf32>
    %138 = arith.addf %69, %137 : vector<8x32xf32>
    %c2 = arith.constant 2 : index
    %c0_77 = arith.constant 0 : index
    %c0_78 = arith.constant 0 : index
    %139 = vector.load %arg1[%c2, %c0_77, %c0_78] : memref<12x32x8xf32, #tpu.memory_space<vmem>>, vector<1x32x8xf32>
    %140 = vector.shape_cast %139 : vector<1x32x8xf32> to vector<32x8xf32>
    %cst_79 = arith.constant dense<0.000000e+00> : vector<16x8xf32>
    %141 = tpu.matmul %0, %140, %cst_79 {dimension_numbers = #tpu.dot_dimension_numbers<[1], [0], [0], [1], [0, 0, 1, 1], [], []>} : vector<16x32xf32>, vector<32x8xf32>, vector<16x8xf32> -> vector<16x8xf32>
    %c2_80 = arith.constant 2 : index
    %c0_81 = arith.constant 0 : index
    %c0_82 = arith.constant 0 : index
    %142 = vector.load %arg2[%c2_80, %c0_81, %c0_82] : memref<12x1x8xf32, #tpu.memory_space<vmem>>, vector<1x1x8xf32>
    %143 = vector.shape_cast %142 : vector<1x1x8xf32> to vector<1x8xf32>
    %144 = vector.broadcast %143 : vector<1x8xf32> to vector<16x8xf32>
    %145 = arith.addf %141, %144 : vector<16x8xf32>
    %c6 = arith.constant 6 : index
    %c0_83 = arith.constant 0 : index
    %c0_84 = arith.constant 0 : index
    %146 = vector.load %arg1[%c6, %c0_83, %c0_84] : memref<12x32x8xf32, #tpu.memory_space<vmem>>, vector<1x32x8xf32>
    %147 = vector.shape_cast %146 : vector<1x32x8xf32> to vector<32x8xf32>
    %cst_85 = arith.constant dense<0.000000e+00> : vector<16x8xf32>
    %148 = tpu.matmul %0, %147, %cst_85 {dimension_numbers = #tpu.dot_dimension_numbers<[1], [0], [0], [1], [0, 0, 1, 1], [], []>} : vector<16x32xf32>, vector<32x8xf32>, vector<16x8xf32> -> vector<16x8xf32>
    %c6_86 = arith.constant 6 : index
    %c0_87 = arith.constant 0 : index
    %c0_88 = arith.constant 0 : index
    %149 = vector.load %arg2[%c6_86, %c0_87, %c0_88] : memref<12x1x8xf32, #tpu.memory_space<vmem>>, vector<1x1x8xf32>
    %150 = vector.shape_cast %149 : vector<1x1x8xf32> to vector<1x8xf32>
    %151 = vector.broadcast %150 : vector<1x8xf32> to vector<16x8xf32>
    %152 = arith.addf %148, %151 : vector<16x8xf32>
    %c10 = arith.constant 10 : index
    %c0_89 = arith.constant 0 : index
    %c0_90 = arith.constant 0 : index
    %153 = vector.load %arg1[%c10, %c0_89, %c0_90] : memref<12x32x8xf32, #tpu.memory_space<vmem>>, vector<1x32x8xf32>
    %154 = vector.shape_cast %153 : vector<1x32x8xf32> to vector<32x8xf32>
    %cst_91 = arith.constant dense<0.000000e+00> : vector<16x8xf32>
    %155 = tpu.matmul %0, %154, %cst_91 {dimension_numbers = #tpu.dot_dimension_numbers<[1], [0], [0], [1], [0, 0, 1, 1], [], []>} : vector<16x32xf32>, vector<32x8xf32>, vector<16x8xf32> -> vector<16x8xf32>
    %c10_92 = arith.constant 10 : index
    %c0_93 = arith.constant 0 : index
    %c0_94 = arith.constant 0 : index
    %156 = vector.load %arg2[%c10_92, %c0_93, %c0_94] : memref<12x1x8xf32, #tpu.memory_space<vmem>>, vector<1x1x8xf32>
    %157 = vector.shape_cast %156 : vector<1x1x8xf32> to vector<1x8xf32>
    %158 = vector.broadcast %157 : vector<1x8xf32> to vector<16x8xf32>
    %159 = arith.addf %155, %158 : vector<16x8xf32>
    %160 = vector.extract_strided_slice %145 {offsets = [0, 0], sizes = [8, 8], strides = [1, 1]} : vector<16x8xf32> to vector<8x8xf32>
    %161 = vector.extract_strided_slice %152 {offsets = [0, 0], sizes = [8, 8], strides = [1, 1]} : vector<16x8xf32> to vector<8x8xf32>
    %162 = vector.extract_strided_slice %159 {offsets = [0, 0], sizes = [8, 8], strides = [1, 1]} : vector<16x8xf32> to vector<8x8xf32>
    %cst_95 = arith.constant dense<0.000000e+00> : vector<8x8xf32>
    %163 = tpu.matmul %160, %161, %cst_95 {dimension_numbers = #tpu.dot_dimension_numbers<[1], [1], [0], [0], [0, 0, 1, 0], [], []>} : vector<8x8xf32>, vector<8x8xf32>, vector<8x8xf32> -> vector<8x8xf32>
    %164 = arith.addf %163, %1 : vector<8x8xf32>
    %cst_96 = arith.constant dense<0xFF800000> : vector<8xf32>
    %165 = vector.multi_reduction <maximumf>, %164, %cst_96 [1] : vector<8x8xf32> to vector<8xf32>
    %166 = vector.shape_cast %165 : vector<8xf32> to vector<8x1xf32>
    %167 = vector.broadcast %166 : vector<8x1xf32> to vector<8x8xf32>
    %168 = arith.subf %164, %167 : vector<8x8xf32>
    %169 = math.exp %168 : vector<8x8xf32>
    %cst_97 = arith.constant dense<0.000000e+00> : vector<8xf32>
    %170 = vector.multi_reduction <add>, %169, %cst_97 [1] : vector<8x8xf32> to vector<8xf32>
    %171 = vector.shape_cast %170 : vector<8xf32> to vector<8x1xf32>
    %172 = tpu.reciprocal %171 {approx = true} : vector<8x1xf32> -> vector<8x1xf32>
    %173 = arith.mulf %171, %172 : vector<8x1xf32>
    %cst_98 = arith.constant 2.000000e+00 : f32
    %174 = vector.broadcast %cst_98 : f32 to vector<8x1xf32>
    %175 = arith.subf %174, %173 : vector<8x1xf32>
    %176 = arith.mulf %172, %175 : vector<8x1xf32>
    %177 = vector.broadcast %176 : vector<8x1xf32> to vector<8x8xf32>
    %178 = arith.mulf %169, %177 : vector<8x8xf32>
    %cst_99 = arith.constant dense<0.000000e+00> : vector<8x8xf32>
    %179 = tpu.matmul %178, %162, %cst_99 {dimension_numbers = #tpu.dot_dimension_numbers<[1], [0], [0], [1], [0, 0, 1, 1], [], []>} : vector<8x8xf32>, vector<8x8xf32>, vector<8x8xf32> -> vector<8x8xf32>
    %c2_100 = arith.constant 2 : index
    %c0_101 = arith.constant 0 : index
    %c0_102 = arith.constant 0 : index
    %180 = vector.load %arg3[%c2_100, %c0_101, %c0_102] : memref<4x8x32xf32, #tpu.memory_space<vmem>>, vector<1x8x32xf32>
    %181 = vector.shape_cast %180 : vector<1x8x32xf32> to vector<8x32xf32>
    %cst_103 = arith.constant dense<0.000000e+00> : vector<8x32xf32>
    %182 = tpu.matmul %179, %181, %cst_103 {dimension_numbers = #tpu.dot_dimension_numbers<[1], [0], [0], [1], [0, 0, 1, 1], [], []>} : vector<8x8xf32>, vector<8x32xf32>, vector<8x32xf32> -> vector<8x32xf32>
    %183 = arith.addf %114, %182 : vector<8x32xf32>
    %184 = vector.extract_strided_slice %145 {offsets = [8, 0], sizes = [8, 8], strides = [1, 1]} : vector<16x8xf32> to vector<8x8xf32>
    %185 = vector.extract_strided_slice %152 {offsets = [8, 0], sizes = [8, 8], strides = [1, 1]} : vector<16x8xf32> to vector<8x8xf32>
    %186 = vector.extract_strided_slice %159 {offsets = [8, 0], sizes = [8, 8], strides = [1, 1]} : vector<16x8xf32> to vector<8x8xf32>
    %cst_104 = arith.constant dense<0.000000e+00> : vector<8x8xf32>
    %187 = tpu.matmul %184, %185, %cst_104 {dimension_numbers = #tpu.dot_dimension_numbers<[1], [1], [0], [0], [0, 0, 1, 0], [], []>} : vector<8x8xf32>, vector<8x8xf32>, vector<8x8xf32> -> vector<8x8xf32>
    %188 = arith.addf %187, %1 : vector<8x8xf32>
    %cst_105 = arith.constant dense<0xFF800000> : vector<8xf32>
    %189 = vector.multi_reduction <maximumf>, %188, %cst_105 [1] : vector<8x8xf32> to vector<8xf32>
    %190 = vector.shape_cast %189 : vector<8xf32> to vector<8x1xf32>
    %191 = vector.broadcast %190 : vector<8x1xf32> to vector<8x8xf32>
    %192 = arith.subf %188, %191 : vector<8x8xf32>
    %193 = math.exp %192 : vector<8x8xf32>
    %cst_106 = arith.constant dense<0.000000e+00> : vector<8xf32>
    %194 = vector.multi_reduction <add>, %193, %cst_106 [1] : vector<8x8xf32> to vector<8xf32>
    %195 = vector.shape_cast %194 : vector<8xf32> to vector<8x1xf32>
    %196 = tpu.reciprocal %195 {approx = true} : vector<8x1xf32> -> vector<8x1xf32>
    %197 = arith.mulf %195, %196 : vector<8x1xf32>
    %cst_107 = arith.constant 2.000000e+00 : f32
    %198 = vector.broadcast %cst_107 : f32 to vector<8x1xf32>
    %199 = arith.subf %198, %197 : vector<8x1xf32>
    %200 = arith.mulf %196, %199 : vector<8x1xf32>
    %201 = vector.broadcast %200 : vector<8x1xf32> to vector<8x8xf32>
    %202 = arith.mulf %193, %201 : vector<8x8xf32>
    %cst_108 = arith.constant dense<0.000000e+00> : vector<8x8xf32>
    %203 = tpu.matmul %202, %186, %cst_108 {dimension_numbers = #tpu.dot_dimension_numbers<[1], [0], [0], [1], [0, 0, 1, 1], [], []>} : vector<8x8xf32>, vector<8x8xf32>, vector<8x8xf32> -> vector<8x8xf32>
    %c2_109 = arith.constant 2 : index
    %c0_110 = arith.constant 0 : index
    %c0_111 = arith.constant 0 : index
    %204 = vector.load %arg3[%c2_109, %c0_110, %c0_111] : memref<4x8x32xf32, #tpu.memory_space<vmem>>, vector<1x8x32xf32>
    %205 = vector.shape_cast %204 : vector<1x8x32xf32> to vector<8x32xf32>
    %cst_112 = arith.constant dense<0.000000e+00> : vector<8x32xf32>
    %206 = tpu.matmul %203, %205, %cst_112 {dimension_numbers = #tpu.dot_dimension_numbers<[1], [0], [0], [1], [0, 0, 1, 1], [], []>} : vector<8x8xf32>, vector<8x32xf32>, vector<8x32xf32> -> vector<8x32xf32>
    %207 = arith.addf %138, %206 : vector<8x32xf32>
    %c3 = arith.constant 3 : index
    %c0_113 = arith.constant 0 : index
    %c0_114 = arith.constant 0 : index
    %208 = vector.load %arg1[%c3, %c0_113, %c0_114] : memref<12x32x8xf32, #tpu.memory_space<vmem>>, vector<1x32x8xf32>
    %209 = vector.shape_cast %208 : vector<1x32x8xf32> to vector<32x8xf32>
    %cst_115 = arith.constant dense<0.000000e+00> : vector<16x8xf32>
    %210 = tpu.matmul %0, %209, %cst_115 {dimension_numbers = #tpu.dot_dimension_numbers<[1], [0], [0], [1], [0, 0, 1, 1], [], []>} : vector<16x32xf32>, vector<32x8xf32>, vector<16x8xf32> -> vector<16x8xf32>
    %c3_116 = arith.constant 3 : index
    %c0_117 = arith.constant 0 : index
    %c0_118 = arith.constant 0 : index
    %211 = vector.load %arg2[%c3_116, %c0_117, %c0_118] : memref<12x1x8xf32, #tpu.memory_space<vmem>>, vector<1x1x8xf32>
    %212 = vector.shape_cast %211 : vector<1x1x8xf32> to vector<1x8xf32>
    %213 = vector.broadcast %212 : vector<1x8xf32> to vector<16x8xf32>
    %214 = arith.addf %210, %213 : vector<16x8xf32>
    %c7 = arith.constant 7 : index
    %c0_119 = arith.constant 0 : index
    %c0_120 = arith.constant 0 : index
    %215 = vector.load %arg1[%c7, %c0_119, %c0_120] : memref<12x32x8xf32, #tpu.memory_space<vmem>>, vector<1x32x8xf32>
    %216 = vector.shape_cast %215 : vector<1x32x8xf32> to vector<32x8xf32>
    %cst_121 = arith.constant dense<0.000000e+00> : vector<16x8xf32>
    %217 = tpu.matmul %0, %216, %cst_121 {dimension_numbers = #tpu.dot_dimension_numbers<[1], [0], [0], [1], [0, 0, 1, 1], [], []>} : vector<16x32xf32>, vector<32x8xf32>, vector<16x8xf32> -> vector<16x8xf32>
    %c7_122 = arith.constant 7 : index
    %c0_123 = arith.constant 0 : index
    %c0_124 = arith.constant 0 : index
    %218 = vector.load %arg2[%c7_122, %c0_123, %c0_124] : memref<12x1x8xf32, #tpu.memory_space<vmem>>, vector<1x1x8xf32>
    %219 = vector.shape_cast %218 : vector<1x1x8xf32> to vector<1x8xf32>
    %220 = vector.broadcast %219 : vector<1x8xf32> to vector<16x8xf32>
    %221 = arith.addf %217, %220 : vector<16x8xf32>
    %c11 = arith.constant 11 : index
    %c0_125 = arith.constant 0 : index
    %c0_126 = arith.constant 0 : index
    %222 = vector.load %arg1[%c11, %c0_125, %c0_126] : memref<12x32x8xf32, #tpu.memory_space<vmem>>, vector<1x32x8xf32>
    %223 = vector.shape_cast %222 : vector<1x32x8xf32> to vector<32x8xf32>
    %cst_127 = arith.constant dense<0.000000e+00> : vector<16x8xf32>
    %224 = tpu.matmul %0, %223, %cst_127 {dimension_numbers = #tpu.dot_dimension_numbers<[1], [0], [0], [1], [0, 0, 1, 1], [], []>} : vector<16x32xf32>, vector<32x8xf32>, vector<16x8xf32> -> vector<16x8xf32>
    %c11_128 = arith.constant 11 : index
    %c0_129 = arith.constant 0 : index
    %c0_130 = arith.constant 0 : index
    %225 = vector.load %arg2[%c11_128, %c0_129, %c0_130] : memref<12x1x8xf32, #tpu.memory_space<vmem>>, vector<1x1x8xf32>
    %226 = vector.shape_cast %225 : vector<1x1x8xf32> to vector<1x8xf32>
    %227 = vector.broadcast %226 : vector<1x8xf32> to vector<16x8xf32>
    %228 = arith.addf %224, %227 : vector<16x8xf32>
    %229 = vector.extract_strided_slice %214 {offsets = [0, 0], sizes = [8, 8], strides = [1, 1]} : vector<16x8xf32> to vector<8x8xf32>
    %230 = vector.extract_strided_slice %221 {offsets = [0, 0], sizes = [8, 8], strides = [1, 1]} : vector<16x8xf32> to vector<8x8xf32>
    %231 = vector.extract_strided_slice %228 {offsets = [0, 0], sizes = [8, 8], strides = [1, 1]} : vector<16x8xf32> to vector<8x8xf32>
    %cst_131 = arith.constant dense<0.000000e+00> : vector<8x8xf32>
    %232 = tpu.matmul %229, %230, %cst_131 {dimension_numbers = #tpu.dot_dimension_numbers<[1], [1], [0], [0], [0, 0, 1, 0], [], []>} : vector<8x8xf32>, vector<8x8xf32>, vector<8x8xf32> -> vector<8x8xf32>
    %233 = arith.addf %232, %1 : vector<8x8xf32>
    %cst_132 = arith.constant dense<0xFF800000> : vector<8xf32>
    %234 = vector.multi_reduction <maximumf>, %233, %cst_132 [1] : vector<8x8xf32> to vector<8xf32>
    %235 = vector.shape_cast %234 : vector<8xf32> to vector<8x1xf32>
    %236 = vector.broadcast %235 : vector<8x1xf32> to vector<8x8xf32>
    %237 = arith.subf %233, %236 : vector<8x8xf32>
    %238 = math.exp %237 : vector<8x8xf32>
    %cst_133 = arith.constant dense<0.000000e+00> : vector<8xf32>
    %239 = vector.multi_reduction <add>, %238, %cst_133 [1] : vector<8x8xf32> to vector<8xf32>
    %240 = vector.shape_cast %239 : vector<8xf32> to vector<8x1xf32>
    %241 = tpu.reciprocal %240 {approx = true} : vector<8x1xf32> -> vector<8x1xf32>
    %242 = arith.mulf %240, %241 : vector<8x1xf32>
    %cst_134 = arith.constant 2.000000e+00 : f32
    %243 = vector.broadcast %cst_134 : f32 to vector<8x1xf32>
    %244 = arith.subf %243, %242 : vector<8x1xf32>
    %245 = arith.mulf %241, %244 : vector<8x1xf32>
    %246 = vector.broadcast %245 : vector<8x1xf32> to vector<8x8xf32>
    %247 = arith.mulf %238, %246 : vector<8x8xf32>
    %cst_135 = arith.constant dense<0.000000e+00> : vector<8x8xf32>
    %248 = tpu.matmul %247, %231, %cst_135 {dimension_numbers = #tpu.dot_dimension_numbers<[1], [0], [0], [1], [0, 0, 1, 1], [], []>} : vector<8x8xf32>, vector<8x8xf32>, vector<8x8xf32> -> vector<8x8xf32>
    %c3_136 = arith.constant 3 : index
    %c0_137 = arith.constant 0 : index
    %c0_138 = arith.constant 0 : index
    %249 = vector.load %arg3[%c3_136, %c0_137, %c0_138] : memref<4x8x32xf32, #tpu.memory_space<vmem>>, vector<1x8x32xf32>
    %250 = vector.shape_cast %249 : vector<1x8x32xf32> to vector<8x32xf32>
    %cst_139 = arith.constant dense<0.000000e+00> : vector<8x32xf32>
    %251 = tpu.matmul %248, %250, %cst_139 {dimension_numbers = #tpu.dot_dimension_numbers<[1], [0], [0], [1], [0, 0, 1, 1], [], []>} : vector<8x8xf32>, vector<8x32xf32>, vector<8x32xf32> -> vector<8x32xf32>
    %252 = arith.addf %183, %251 : vector<8x32xf32>
    %253 = vector.extract_strided_slice %214 {offsets = [8, 0], sizes = [8, 8], strides = [1, 1]} : vector<16x8xf32> to vector<8x8xf32>
    %254 = vector.extract_strided_slice %221 {offsets = [8, 0], sizes = [8, 8], strides = [1, 1]} : vector<16x8xf32> to vector<8x8xf32>
    %255 = vector.extract_strided_slice %228 {offsets = [8, 0], sizes = [8, 8], strides = [1, 1]} : vector<16x8xf32> to vector<8x8xf32>
    %cst_140 = arith.constant dense<0.000000e+00> : vector<8x8xf32>
    %256 = tpu.matmul %253, %254, %cst_140 {dimension_numbers = #tpu.dot_dimension_numbers<[1], [1], [0], [0], [0, 0, 1, 0], [], []>} : vector<8x8xf32>, vector<8x8xf32>, vector<8x8xf32> -> vector<8x8xf32>
    %257 = arith.addf %256, %1 : vector<8x8xf32>
    %cst_141 = arith.constant dense<0xFF800000> : vector<8xf32>
    %258 = vector.multi_reduction <maximumf>, %257, %cst_141 [1] : vector<8x8xf32> to vector<8xf32>
    %259 = vector.shape_cast %258 : vector<8xf32> to vector<8x1xf32>
    %260 = vector.broadcast %259 : vector<8x1xf32> to vector<8x8xf32>
    %261 = arith.subf %257, %260 : vector<8x8xf32>
    %262 = math.exp %261 : vector<8x8xf32>
    %cst_142 = arith.constant dense<0.000000e+00> : vector<8xf32>
    %263 = vector.multi_reduction <add>, %262, %cst_142 [1] : vector<8x8xf32> to vector<8xf32>
    %264 = vector.shape_cast %263 : vector<8xf32> to vector<8x1xf32>
    %265 = tpu.reciprocal %264 {approx = true} : vector<8x1xf32> -> vector<8x1xf32>
    %266 = arith.mulf %264, %265 : vector<8x1xf32>
    %cst_143 = arith.constant 2.000000e+00 : f32
    %267 = vector.broadcast %cst_143 : f32 to vector<8x1xf32>
    %268 = arith.subf %267, %266 : vector<8x1xf32>
    %269 = arith.mulf %265, %268 : vector<8x1xf32>
    %270 = vector.broadcast %269 : vector<8x1xf32> to vector<8x8xf32>
    %271 = arith.mulf %262, %270 : vector<8x8xf32>
    %cst_144 = arith.constant dense<0.000000e+00> : vector<8x8xf32>
    %272 = tpu.matmul %271, %255, %cst_144 {dimension_numbers = #tpu.dot_dimension_numbers<[1], [0], [0], [1], [0, 0, 1, 1], [], []>} : vector<8x8xf32>, vector<8x8xf32>, vector<8x8xf32> -> vector<8x8xf32>
    %c3_145 = arith.constant 3 : index
    %c0_146 = arith.constant 0 : index
    %c0_147 = arith.constant 0 : index
    %273 = vector.load %arg3[%c3_145, %c0_146, %c0_147] : memref<4x8x32xf32, #tpu.memory_space<vmem>>, vector<1x8x32xf32>
    %274 = vector.shape_cast %273 : vector<1x8x32xf32> to vector<8x32xf32>
    %cst_148 = arith.constant dense<0.000000e+00> : vector<8x32xf32>
    %275 = tpu.matmul %272, %274, %cst_148 {dimension_numbers = #tpu.dot_dimension_numbers<[1], [0], [0], [1], [0, 0, 1, 1], [], []>} : vector<8x8xf32>, vector<8x32xf32>, vector<8x32xf32> -> vector<8x32xf32>
    %276 = arith.addf %207, %275 : vector<8x32xf32>
    %277 = vector.broadcast %2 : vector<1x32xf32> to vector<8x32xf32>
    %278 = arith.addf %252, %277 : vector<8x32xf32>
    %c0_149 = arith.constant 0 : index
    %c0_150 = arith.constant 0 : index
    %279 = vector.load %arg6[%c0_149, %c0_150] : memref<16x32xf32, #tpu.memory_space<vmem>>, vector<8x32xf32>
    tpu.vector_store %arg6[%c0_149, %c0_150], %278 {strides = array<i32>} : memref<16x32xf32, #tpu.memory_space<vmem>>, vector<8x32xf32>,
    %280 = vector.broadcast %2 : vector<1x32xf32> to vector<8x32xf32>
    %281 = arith.addf %276, %280 : vector<8x32xf32>
    %c8_151 = arith.constant 8 : index
    %c0_152 = arith.constant 0 : index
    %282 = vector.load %arg6[%c8_151, %c0_152] : memref<16x32xf32, #tpu.memory_space<vmem>>, vector<8x32xf32>
    tpu.vector_store %arg6[%c8_151, %c0_152], %281 {strides = array<i32>} : memref<16x32xf32, #tpu.memory_space<vmem>>, vector<8x32xf32>,
    return
  }
}

</mosaic_0001>

<bundles_post_ra>
// kernel: tpu_custom_call.1
= control target key start
LH: loop header
LB: loop body
LE: loop exit
PB: predicated region body
PF: predicated region fallthrough
CT: control target
= control target key end

     0   :  { %vm39_vm0 = vcmask 261120   ;;  %s4129_s0 = inlined_call_operand.vmem [shape: f32[16,32], index: 0, kind: input, shape index: {}]   ;;  %s4130_s1 = inlined_call_operand.vmem [shape: f32[12,32,8], index: 1, kind: input, shape index: {}]   ;;  %s4131_s2 = inlined_call_operand.vmem [shape: f32[12,1,8], index: 2, kind: input, shape index: {}]   ;;  %s4132_s3 = inlined_call_operand.vmem [shape: f32[4,8,32], index: 3, kind: input, shape index: {}]   ;;  %s4133_s4 = inlined_call_operand.vmem [shape: f32[1,32], index: 4, kind: input, shape index: {}]   ;;  %s4134_s5 = inlined_call_operand.vmem [shape: f32[8,8], index: 5, kind: input, shape index: {}]   ;;  %s4135_s6 = inlined_call_operand.hbm [shape: f32[16,32], index: 6, kind: output, shape index: {}]  }
   0x1   :  { %v3018_v0 = vld [vmem:[%s4130_s1 + $0x80] sm:$0xff]  ;;  %v3019_v1 = vld [vmem:[%s4130_s1 + $0x88] sm:$0xff]  ;;  %v3020_v5 = vld [vmem:[%s4130_s1 + $0x90] sm:$0xff] }
   0x2   :  { %v28_v2 = vld [vmem:[%s4130_s1] sm:$0xff]  ;;  %v3522_v3 = vpack.c.bf16 %v3019_v1, %v3018_v0  ;;  %v29_v4 = vld [vmem:[%s4130_s1 + $0x8] sm:$0xff]  ;;  %v3021_v6 = vld [vmem:[%s4130_s1 + $0x98] sm:$0xff] }
   0x3   :  { %v3514_v7 = vpack.c.bf16 %v29_v4, %v28_v2  ;;  %v3526_v8 = vpack.c.bf16 %v3021_v6, %v3020_v5  ;;  %v30_v9 = vld [vmem:[%s4130_s1 + $0x10] sm:$0xff]  ;;  %v31_v10 = vld [vmem:[%s4130_s1 + $0x18] sm:$0xff]  ;;  %v3738_v11 = vld [vmem:[%s4129_s0] sm:$0xff] }
   0x4   :  { %3523 = vmatprep.subr.bf16.mxu1 %v3522_v3  ;;  %v3518_v12 = vpack.c.bf16 %v31_v10, %v30_v9  ;;  %3281 = vmatprep.mubr.msk.f32.mxu1 %vm39_vm0, %v3738_v11  ;;  %v3026_v13 = vld [vmem:[%s4130_s1 + $0x100] sm:$0xff]  ;;  %v3027_v14 = vld [vmem:[%s4130_s1 + $0x108] sm:$0xff] }
   0x5   :  { %3525 = vmatpush3.bf16.msra.mxu1 %v3522_v3  ;;  %3515 = vmatprep.subr.bf16.mxu0 %v3514_v7 }
   0x6   :  { %11 = vsyncpa [#allocation3], 0  ;;  %3517 = vmatpush3.bf16.msra.mxu0 %v3514_v7  ;;  %3527 = vmatprep.subr.bf16.mxu1 %v3526_v8  ;;  %v3530_v15 = vpack.c.bf16 %v3027_v14, %v3026_v13  ;;  %v3028_v16 = vld [vmem:[%s4130_s1 + $0x110] sm:$0xff]  ;;  %v3029_v17 = vld [vmem:[%s4130_s1 + $0x118] sm:$0xff]  ;;  %v3671_v20 = vmov 0.0   ;;  %vm3672_vm1 = vmmov 0  }
   0x7   :  { %3519 = vmatprep.subr.bf16.mxu0 %v3518_v12  ;;  %3270 = vmatprep.mubr.msk.f32.mxu0 %vm39_vm0, %v3738_v11  ;;  %v3759_v18 = vld [vmem:[%s4129_s0 + $0x8] sm:$0xff]  ;;  %v3534_v19 = vpack.c.bf16 %v3029_v17, %v3028_v16  ;;  %v3023_v21 = vld [vmem:[%s4131_s2 + $0x4] ss:$0 sm:$0xff]  ;;  %v3015_v22 = vld [vmem:[%s4131_s2] ss:$0 sm:$0xff]  ;;  %vm297_vm2 = vcmask 64512  }
   0x8   :  { %v3031_v31 = vld [vmem:[%s4131_s2 + $0x8] ss:$0 sm:$0xff]  ;;  %v3797_v36 = vld [vmem:[%s4134_s5] sm:$0xff]  ;;  %v3042_v58 = vld [vmem:[%s4130_s1 + $0x30] sm:$0xff] }
   0x9   :  { %3529 = vmatpush3.bf16.msra.mxu1 %v3526_v8  ;;  %v3040_v55 = vld [vmem:[%s4130_s1 + $0x20] sm:$0xff]  ;;  %v3041_v56 = vld [vmem:[%s4130_s1 + $0x28] sm:$0xff]  ;;  %v3043_v59 = vld [vmem:[%s4130_s1 + $0x38] sm:$0xff] }
   0xa   :  { %3521 = vmatpush3.bf16.msra.mxu0 %v3518_v12  ;;  %3295 = vmatprep.subr.mxu1 %v3671_v20  ;;  %v3538_v57 = vpack.c.bf16 %v3041_v56, %v3040_v55  ;;  %v3542_v60 = vpack.c.bf16 %v3043_v59, %v3042_v58  ;;  %v3048_v3 = vld [vmem:[%s4130_s1 + $0xa0] sm:$0xff]  ;;  %v3049_v4 = vld [vmem:[%s4130_s1 + $0xa8] sm:$0xff]  ;;  %v3050_v10 = vld [vmem:[%s4130_s1 + $0xb0] sm:$0xff] }
   0xb   :  { %3531 = vmatprep.subr.bf16.mxu0 %v3530_v15  ;;  %v3546_v9 = vpack.c.bf16 %v3049_v4, %v3048_v3  ;;  %v3051_v12 = vld [vmem:[%s4130_s1 + $0xb8] sm:$0xff]  ;;  %v3045_v17 = vld [vmem:[%s4131_s2 + $0x1] ss:$0 sm:$0xff] }
   0xc   :  { %3282 = vmatmul.mubr.msk.f32.vlgmr.msra.gmra.mrb[0].mxu1 %vm39_vm0, %v3759_v18 }
   0xd   :  { %3271 = vmatmul.mubr.msk.f32.vlgmr.msra.gmra.mrb[0].mxu0 %vm39_vm0, %v3759_v18  ;;  %3297 = vmatprep.mubr.msk.f32.mxu1 %vm3672_vm1, %v3671_v20 }
   0xe   :  { %3533 = vmatpush3.bf16.msra.mxu0 %v3530_v15  ;;  %3292 = vmatprep.mubr.msk.f32.mxu0 %vm39_vm0, %v3738_v11  ;;  %v3550_v15 = vpack.c.bf16 %v3051_v12, %v3050_v10 }
   0xf   :  { %3535 = vmatprep.subr.bf16.mxu0 %v3534_v19 }
  0x12   :  { %3537 = vmatpush3.bf16.msra.mxu0 %v3534_v19 }
  0x13   :  { %3305 = vmatprep.subr.mxu0 %v3671_v20 }
  0x15   :  { %3293 = vmatmul.mubr.msk.f32.vlgmr.msra.gmra.mrb[2].mxu0 %vm39_vm0, %v3759_v18 }
  0x16   :  { %3307 = vmatprep.mubr.msk.f32.mxu0 %vm3672_vm1, %v3671_v20 }
  0xdf   :  { %v3283_v23 = vpop.f32.mrb[0].mxu1 }
  0xe0   :  { %v206_v24 = vadd.f32 %v3283_v23, %v3023_v21  ;;  %v200_v25 = vpop.f32.mrb[1].mxu1  ;;  %v3272_v26 = vpop.f32.mrb[0].mxu0 }
  0xe1   :  { %v201_v27 = vadd.f32 %v3023_v21, %v200_v25  ;;  %v118_v28 = vadd.f32 %v3272_v26, %v3015_v22  ;;  %v112_v29 = vpop.f32.mrb[1].mxu0  ;;  %v3053_v26 = vld [vmem:[%s4131_s2 + $0x5] ss:$0 sm:$0xff] }
  0xe2   :  { %v113_v30 = vadd.f32 %v3015_v22, %v112_v29  ;;  %3306 = vmatpush3.xpose.msk.msra.mxu0 %vm297_vm2, %v206_v24 }
  0xe3   :  { %3296 = vmatpush3.xpose.msk.msra.mxu1 %vm297_vm2, %v201_v27  ;;  %3539 = vmatprep.subr.bf16.mxu0 %v3538_v57 }
  0xe4   :  { %3300 = vmatprep.subr.mxu1 %v3671_v20 }
  0xe5   :  { %3308 = vmatmul.mubr.msk.f32.vlgmr.msra.gmra.mrb[4].mxu0 %vm297_vm2, %v118_v28 }
  0xe6   :  { %3298 = vmatmul.mubr.msk.f32.vlgmr.msra.gmra.mrb[2].mxu1 %vm297_vm2, %v113_v30  ;;  %3323 = vmatprep.mubr.msk.f32.mxu0 %vm39_vm0, %v3738_v11 }
  0xe7   :  { %3302 = vmatprep.mubr.msk.f32.mxu1 %vm3672_vm1, %v3671_v20  ;;  %3541 = vmatpush3.bf16.msra.mxu0 %v3538_v57 }
  0xe8   :  { %v3294_v32 = vpop.f32.mrb[2].mxu0  ;;  %3543 = vmatprep.subr.bf16.mxu0 %v3542_v60 }
  0xe9   :  { %v294_v33 = vadd.f32 %v3294_v32, %v3031_v31  ;;  %v288_v34 = vpop.f32.mrb[3].mxu0  ;;  %v3056_v32 = vld [vmem:[%s4130_s1 + $0x120] sm:$0xff] }
  0xea   :  { %v289_v35 = vadd.f32 %v3031_v31, %v288_v34  ;;  %v3058_v34 = vld [vmem:[%s4130_s1 + $0x130] sm:$0xff] }
  0xeb   :  { %3545 = vmatpush3.bf16.msra.mxu0 %v3542_v60  ;;  %v461_v60 = vld [vmem:[%s4132_s3] sm:$0xff] }
  0xec   :  { %3301 = vmatpush3.msra.mxu1 %v289_v35 }
  0xed   :  { %3310 = vmatprep.subr.mxu1 %v3671_v20 }
  0xee   :  { %3324 = vmatmul.mubr.msk.f32.vlgmr.msra.gmra.mrb[6].mxu0 %vm39_vm0, %v3759_v18 }
  0xef   :  { %3345 = vmatprep.mubr.msk.f32.mxu0 %vm39_vm0, %v3738_v11 }
 0x1b8   :  { %v534_v37 = vpop.f32.mrb[4].mxu0 }
 0x1b9   :  { %v370_v38 = vpop.f32.mrb[2].mxu1  ;;  %v3309_v39 = vpop.f32.mrb[5].mxu0  ;;  %v535_v42 = vadd.f32 %v534_v37, %v3797_v36  ;;  %v3059_v37 = vld [vmem:[%s4130_s1 + $0x138] sm:$0xff] }
 0x1ba   :  { %v371_v40 = vadd.f32 %v370_v38, %v3797_v36  ;;  %v3299_v41 = vpop.f32.mrb[3].mxu1  ;;  %v3558_v38 = vpack.c.bf16 %v3059_v37, %v3058_v34 }
 0x1bb   :  { %v538_v44 = vsel %vm297_vm2, %v535_v42, -inf }
 0x1bc   :  { %v374_v43 = vsel %vm297_vm2, %v371_v40, -inf }
 0x1bd   :  { %375 = vmax.xlane.f32.xlu0 %v374_v43 }
 0x1c1   :  { %539 = vmax.xlane.f32.xlu0 %v538_v44  ;;  %v3325_v16 = vpop.f32.mrb[6].mxu0 }
 0x1c2   :  { %v3847_v19 = vadd.f32 %v3325_v16, %v3045_v17  ;;  %v704_v21 = vpop.f32.mrb[7].mxu0 }
 0x1c3   :  { %v705_v31 = vadd.f32 %v3045_v17, %v704_v21  ;;  %v3084_v21 = vld [vmem:[%s4130_s1 + $0xc8] sm:$0xff] }
 0x24a   :  { %v376_v45 = vpop.xlane.xlu0 %375 }
 0x24b   :  { %v377_v46 = vsub.f32 %v371_v40, %v376_v45 }
 0x24d   :  { %v378_v47 = vmul.f32 1.442695, %v377_v46 }
 0x24e   :  { %v540_v48 = vpop.xlane.xlu0 %539 }
 0x24f   :  { %3615 = vpow2.f32 %v378_v47  ;;  %v541_v49 = vsub.f32 %v535_v42, %v540_v48 }
 0x251   :  { %v542_v50 = vmul.f32 1.442695, %v541_v49  ;;  %v3061_v49 = vld [vmem:[%s4131_s2 + $0x9] ss:$0 sm:$0xff] }
 0x253   :  { %3617 = vpow2.f32 %v542_v50 }
 0x259   :  { %v3616_v51 = vpop.eup %3615 }
 0x25a   :  { %v380_v52 = vsel %vm297_vm2, %v3616_v51, 0.0 }
 0x25b   :  { %381 = vadd.xlane.f32.xlu1 %v380_v52 }
 0x25d   :  { %v3618_v53 = vpop.eup %3617 }
 0x25e   :  { %v544_v54 = vsel %vm297_vm2, %v3618_v53, 0.0 }
 0x25f   :  { %545 = vadd.xlane.f32.xlu1 %v544_v54 }
 0x2e8   :  { %v382_v61 = vpop.xlane.xlu1 %381 }
 0x2e9   :  { %3619 = vrcp.f32 %v382_v61 }
 0x2ec   :  { %v546_v62 = vpop.xlane.xlu1 %545 }
 0x2ed   :  { %3621 = vrcp.f32 %v546_v62 }
 0x2f3   :  { %v3620_v63 = vpop.eup %3619 }
 0x2f4   :  { %v384_v0 = vmul.f32 %v3620_v63, %v382_v61 }
 0x2f6   :  { %v385_v1 = vsub.f32 2.0, %v384_v0 }
 0x2f7   :  { %v3622_v2 = vpop.eup %3621 }
 0x2f8   :  { %v386_v5 = vmul.f32 %v3620_v63, %v385_v1  ;;  %v548_v6 = vmul.f32 %v3622_v2, %v546_v62 }
 0x2fa   :  { %v387_v7 = vmul.f32 %v3616_v51, %v386_v5  ;;  %v549_v8 = vsub.f32 2.0, %v548_v6 }
 0x2fc   :  { %v550_v13 = vmul.f32 %v3622_v2, %v549_v8  ;;  %3303 = vmatmul.mubr.msk.f32.vlgmr.msra.gmra.mrb[4].mxu1 %vm297_vm2, %v387_v7 }
 0x2fd   :  { %3311 = vmatpush3.msra.mxu1 %v294_v33  ;;  %3312 = vmatprep.mubr.msk.f32.mxu1 %vm3672_vm1, %v3671_v20  ;;  %v3057_v33 = vld [vmem:[%s4130_s1 + $0x128] sm:$0xff] }
 0x2fe   :  { %v551_v14 = vmul.f32 %v3618_v53, %v550_v13  ;;  %3547 = vmatprep.subr.bf16.mxu1 %v3546_v9  ;;  %v3554_v35 = vpack.c.bf16 %v3057_v33, %v3056_v32  ;;  %v3067_v53 = vld [vmem:[%s4132_s3 + $0x8] sm:$0xff]  ;;  %v3078_v32 = vld [vmem:[%s4130_s1 + $0x58] sm:$0xff] }
 0x300   :  { %3313 = vmatmul.mubr.msk.f32.vlgmr.msra.gmra.mrb[6].mxu1 %vm297_vm2, %v551_v14  ;;  %3555 = vmatprep.subr.bf16.mxu0 %v3554_v35 }
 0x301   :  { %3549 = vmatpush3.bf16.msra.mxu1 %v3546_v9  ;;  %3334 = vmatprep.mubr.msk.f32.mxu1 %vm39_vm0, %v3738_v11 }
 0x302   :  { %3551 = vmatprep.subr.bf16.mxu1 %v3550_v15  ;;  %3557 = vmatpush3.bf16.msra.mxu0 %v3554_v35 }
 0x303   :  { %3559 = vmatprep.subr.bf16.mxu0 %v3558_v38 }
 0x305   :  { %3553 = vmatpush3.bf16.msra.mxu1 %v3550_v15 }
 0x306   :  { %3348 = vmatprep.subr.mxu1 %v3671_v20  ;;  %3561 = vmatpush3.bf16.msra.mxu0 %v3558_v38 }
 0x307   :  { %3358 = vmatprep.subr.mxu0 %v3671_v20 }
 0x308   :  { %3335 = vmatmul.mubr.msk.f32.vlgmr.msra.gmra.mrb[8].mxu1 %vm39_vm0, %v3759_v18 }
 0x309   :  { %3350 = vmatprep.mubr.msk.f32.mxu1 %vm3672_vm1, %v3671_v20  ;;  %3346 = vmatmul.mubr.msk.f32.vlgmr.msra.gmra.mrb[8].mxu0 %vm39_vm0, %v3759_v18 }
 0x30a   :  { %3360 = vmatprep.mubr.msk.f32.mxu0 %vm3672_vm1, %v3671_v20  ;;  %3359 = vmatpush3.msra.mxu0 %v3067_v53 }
 0x30b   :  { %3368 = vmatprep.subr.mxu0 %v3671_v20 }
 0x3cf   :  { %v457_v22 = vpop.f32.mrb[4].mxu1 }
 0x3d0   :  { %v3304_v23 = vpop.f32.mrb[5].mxu1 }
 0x3d3   :  { %v3849_v24 = vpop.f32.mrb[6].mxu1 }
 0x3d4   :  { %v3314_v25 = vpop.f32.mrb[7].mxu1 }
 0x3db   :  { %v3336_v27 = vpop.f32.mrb[8].mxu1 }
 0x3dc   :  { %v798_v28 = vadd.f32 %v3336_v27, %v3053_v26  ;;  %v792_v29 = vpop.f32.mrb[9].mxu1  ;;  %v3347_v48 = vpop.f32.mrb[8].mxu0  ;;  %v3076_v27 = vld [vmem:[%s4130_s1 + $0x48] sm:$0xff] }
 0x3dd   :  { %v793_v30 = vadd.f32 %v3053_v26, %v792_v29  ;;  %v880_v50 = vpop.f32.mrb[9].mxu0  ;;  %v886_v51 = vadd.f32 %v3347_v48, %v3061_v49  ;;  %v3075_v26 = vld [vmem:[%s4130_s1 + $0x40] sm:$0xff] }
 0x3de   :  { %v881_v52 = vadd.f32 %v3061_v49, %v880_v50  ;;  %v3562_v29 = vpack.c.bf16 %v3076_v27, %v3075_v26 }
 0x3df   :  { %3349 = vmatpush3.xpose.msk.msra.mxu1 %vm297_vm2, %v793_v30 }
 0x3e0   :  { %3353 = vmatprep.subr.mxu1 %v3671_v20 }
 0x3e2   :  { %3351 = vmatmul.mubr.msk.f32.vlgmr.msra.gmra.mrb[10].mxu1 %vm297_vm2, %v705_v31  ;;  %v3077_v31 = vld [vmem:[%s4130_s1 + $0x50] sm:$0xff] }
 0x3e3   :  { %3355 = vmatprep.mubr.msk.f32.mxu1 %vm3672_vm1, %v3671_v20  ;;  %3354 = vmatpush3.msra.mxu1 %v881_v52  ;;  %v3566_v33 = vpack.c.bf16 %v3078_v32, %v3077_v31  ;;  %v3091_v52 = vld [vmem:[%s4130_s1 + $0x140] sm:$0xff] }
 0x3e4   :  { %3363 = vmatprep.subr.mxu1 %v3671_v20 }
 0x4b5   :  { %v961_v39 = vpop.f32.mrb[10].mxu1 }
 0x4b6   :  { %v962_v40 = vadd.f32 %v961_v39, %v3797_v36  ;;  %v3352_v41 = vpop.f32.mrb[11].mxu1  ;;  %v3088_v39 = vld [vmem:[%s4131_s2 + $0x6] ss:$0 sm:$0xff] }
 0x4b8   :  { %v965_v42 = vsel %vm297_vm2, %v962_v40, -inf }
 0x4b9   :  { %966 = vmax.xlane.f32.xlu0 %v965_v42 }
 0x546   :  { %v967_v43 = vpop.xlane.xlu0 %966 }
 0x547   :  { %v968_v44 = vsub.f32 %v962_v40, %v967_v43 }
 0x549   :  { %v969_v45 = vmul.f32 1.442695, %v968_v44 }
 0x54b   :  { %3623 = vpow2.f32 %v969_v45 }
 0x555   :  { %v3624_v46 = vpop.eup %3623 }
 0x556   :  { %v971_v47 = vsel %vm297_vm2, %v3624_v46, 0.0 }
 0x557   :  { %972 = vadd.xlane.f32.xlu1 %v971_v47  ;;  %v3080_v47 = vld [vmem:[%s4131_s2 + $0x2] ss:$0 sm:$0xff] }
 0x5e4   :  { %v973_v54 = vpop.xlane.xlu1 %972 }
 0x5e5   :  { %3625 = vrcp.f32 %v973_v54 }
 0x5ef   :  { %v3626_v55 = vpop.eup %3625 }
 0x5f0   :  { %v975_v56 = vmul.f32 %v3626_v55, %v973_v54  ;;  %v3093_v54 = vld [vmem:[%s4130_s1 + $0x150] sm:$0xff] }
 0x5f2   :  { %v976_v57 = vsub.f32 2.0, %v975_v56  ;;  %v3094_v56 = vld [vmem:[%s4130_s1 + $0x158] sm:$0xff] }
 0x5f4   :  { %v977_v58 = vmul.f32 %v3626_v55, %v976_v57  ;;  %v3582_v57 = vpack.c.bf16 %v3094_v56, %v3093_v54 }
 0x5f6   :  { %v978_v59 = vmul.f32 %v3624_v46, %v977_v58 }
 0x5f8   :  { %3356 = vmatmul.mubr.msk.f32.vlgmr.msra.gmra.mrb[12].mxu1 %vm297_vm2, %v978_v59 }
 0x5f9   :  { %3364 = vmatpush3.msra.mxu1 %v461_v60  ;;  %3365 = vmatprep.mubr.msk.f32.mxu1 %vm3672_vm1, %v3671_v20 }
 0x5fa   :  { %3373 = vmatprep.subr.mxu1 %v3671_v20 }
 0x5fc   :  { %3366 = vmatmul.mubr.msk.f32.vlgmr.msra.gmra.mrb[14].mxu1 %vm297_vm2, %v457_v22 }
 0x5fd   :  { %3374 = vmatpush3.msra.mxu1 %v886_v51  ;;  %3375 = vmatprep.mubr.msk.f32.mxu1 %vm3672_vm1, %v3671_v20 }
 0x5fe   :  { %3383 = vmatprep.subr.mxu1 %v3671_v20 }
 0x6cb   :  { %v1048_v61 = vpop.f32.mrb[12].mxu1 }
 0x6cc   :  { %v3357_v62 = vpop.f32.mrb[13].mxu1  ;;  %3361 = vmatmul.mubr.msk.f32.vlgmr.msra.gmra.mrb[10].mxu0 %vm297_vm2, %v1048_v61 }
 0x6cd   :  { %3369 = vmatpush3.xpose.msk.msra.mxu0 %vm297_vm2, %v798_v28  ;;  %3370 = vmatprep.mubr.msk.f32.mxu0 %vm3672_vm1, %v3671_v20  ;;  %v3085_v28 = vld [vmem:[%s4130_s1 + $0xd0] sm:$0xff] }
 0x6ce   :  { %3378 = vmatprep.subr.mxu0 %v3671_v20 }
 0x6cf   :  { %v1196_v63 = vpop.f32.mrb[14].mxu1 }
 0x6d0   :  { %v3367_v0 = vpop.f32.mrb[15].mxu1  ;;  %3371 = vmatmul.mubr.msk.f32.vlgmr.msra.gmra.mrb[12].mxu0 %vm297_vm2, %v3847_v19  ;;  %v3083_v19 = vld [vmem:[%s4130_s1 + $0xc0] sm:$0xff] }
 0x6d1   :  { %3379 = vmatpush3.msra.mxu0 %v3067_v53  ;;  %3380 = vmatprep.mubr.msk.f32.mxu0 %vm3672_vm1, %v3671_v20  ;;  %v3570_v25 = vpack.c.bf16 %v3084_v21, %v3083_v19  ;;  %v3092_v53 = vld [vmem:[%s4130_s1 + $0x148] sm:$0xff] }
 0x6d2   :  { %3563 = vmatprep.subr.bf16.mxu0 %v3562_v29  ;;  %v3578_v55 = vpack.c.bf16 %v3092_v53, %v3091_v52 }
 0x79f   :  { %v1123_v1 = vpop.f32.mrb[10].mxu0 }
 0x7a0   :  { %v3907_v2 = vadd.f32 %v1196_v63, %v1123_v1  ;;  %v3362_v3 = vpop.f32.mrb[11].mxu0 }
 0x7a3   :  { %v1272_v4 = vpop.f32.mrb[12].mxu0 }
 0x7a4   :  { %v1273_v5 = vadd.f32 %v1272_v4, %v3797_v36  ;;  %v3372_v6 = vpop.f32.mrb[13].mxu0 }
 0x7a6   :  { %v1276_v7 = vsel %vm297_vm2, %v1273_v5, -inf }
 0x7a7   :  { %1277 = vmax.xlane.f32.xlu0 %v1276_v7 }
 0x834   :  { %v1278_v8 = vpop.xlane.xlu0 %1277 }
 0x835   :  { %v1279_v9 = vsub.f32 %v1273_v5, %v1278_v8  ;;  %v3096_v5 = vld [vmem:[%s4131_s2 + $0xa] ss:$0 sm:$0xff] }
 0x837   :  { %v1280_v10 = vmul.f32 1.442695, %v1279_v9  ;;  %v3102_v9 = vld [vmem:[%s4132_s3 + $0x10] sm:$0xff] }
 0x839   :  { %3627 = vpow2.f32 %v1280_v10 }
 0x843   :  { %v3628_v12 = vpop.eup %3627 }
 0x844   :  { %v1282_v13 = vsel %vm297_vm2, %v3628_v12, 0.0 }
 0x845   :  { %1283 = vadd.xlane.f32.xlu1 %v1282_v13 }
 0x8d2   :  { %v1284_v14 = vpop.xlane.xlu1 %1283 }
 0x8d3   :  { %3629 = vrcp.f32 %v1284_v14 }
 0x8dd   :  { %v3630_v15 = vpop.eup %3629 }
 0x8de   :  { %v1286_v16 = vmul.f32 %v3630_v15, %v1284_v14 }
 0x8e0   :  { %v1287_v17 = vsub.f32 2.0, %v1286_v16 }
 0x8e2   :  { %v1288_v22 = vmul.f32 %v3630_v15, %v1287_v17 }
 0x8e4   :  { %v1289_v23 = vmul.f32 %v3628_v12, %v1288_v22 }
 0x8e6   :  { %3376 = vmatmul.mubr.msk.f32.vlgmr.msra.gmra.mrb[16].mxu1 %vm297_vm2, %v1289_v23 }
 0x8e7   :  { %3384 = vmatpush3.msra.mxu1 %v461_v60  ;;  %3385 = vmatprep.mubr.msk.f32.mxu1 %vm3672_vm1, %v3671_v20 }
 0x8e8   :  { %3571 = vmatprep.subr.bf16.mxu1 %v3570_v25 }
 0x8ea   :  { %3386 = vmatmul.mubr.msk.f32.vlgmr.msra.gmra.mrb[18].mxu1 %vm297_vm2, %v3849_v24  ;;  %v3086_v24 = vld [vmem:[%s4130_s1 + $0xd8] sm:$0xff] }
 0x8eb   :  { %3573 = vmatpush3.bf16.msra.mxu1 %v3570_v25  ;;  %3407 = vmatprep.mubr.msk.f32.mxu1 %vm39_vm0, %v3738_v11  ;;  %v3574_v30 = vpack.c.bf16 %v3086_v24, %v3085_v28 }
 0x8ed   :  { %3575 = vmatprep.subr.bf16.mxu1 %v3574_v30 }
 0x8ef   :  { %3577 = vmatpush3.bf16.msra.mxu1 %v3574_v30 }
 0x8f0   :  { %3421 = vmatprep.subr.mxu1 %v3671_v20 }
 0x8f2   :  { %3408 = vmatmul.mubr.msk.f32.vlgmr.msra.gmra.mrb[20].mxu1 %vm39_vm0, %v3759_v18 }
 0x8f3   :  { %3423 = vmatprep.mubr.msk.f32.mxu1 %vm3672_vm1, %v3671_v20 }
 0x9b9   :  { %v1359_v34 = vpop.f32.mrb[16].mxu1 }
 0x9ba   :  { %v3377_v35 = vpop.f32.mrb[17].mxu1  ;;  %3381 = vmatmul.mubr.msk.f32.vlgmr.msra.gmra.mrb[14].mxu0 %vm297_vm2, %v1359_v34 }
 0x9bb   :  { %3565 = vmatpush3.bf16.msra.mxu0 %v3562_v29  ;;  %3396 = vmatprep.mubr.msk.f32.mxu0 %vm39_vm0, %v3738_v11 }
 0x9bc   :  { %3567 = vmatprep.subr.bf16.mxu0 %v3566_v33 }
 0x9bd   :  { %v1505_v37 = vpop.f32.mrb[18].mxu1 }
 0x9be   :  { %v3387_v38 = vpop.f32.mrb[19].mxu1 }
 0x9bf   :  { %3569 = vmatpush3.bf16.msra.mxu0 %v3566_v33 }
 0x9c0   :  { %3579 = vmatprep.subr.bf16.mxu0 %v3578_v55 }
 0x9c2   :  { %3397 = vmatmul.mubr.msk.f32.vlgmr.msra.gmra.mrb[16].mxu0 %vm39_vm0, %v3759_v18 }
 0x9c3   :  { %3418 = vmatprep.mubr.msk.f32.mxu0 %vm39_vm0, %v3738_v11  ;;  %3581 = vmatpush3.bf16.msra.mxu0 %v3578_v55  ;;  %v3113_v55 = vld [vmem:[%s4131_s2 + $0x3] ss:$0 sm:$0xff] }
 0x9c4   :  { %3583 = vmatprep.subr.bf16.mxu0 %v3582_v57 }
 0x9c5   :  { %v3409_v40 = vpop.f32.mrb[20].mxu1 }
 0x9c6   :  { %v1682_v41 = vadd.f32 %v3409_v40, %v3088_v39  ;;  %v1676_v42 = vpop.f32.mrb[21].mxu1  ;;  %v3116_v40 = vld [vmem:[%s4130_s1 + $0xe0] sm:$0xff] }
 0x9c7   :  { %v1677_v43 = vadd.f32 %v3088_v39, %v1676_v42  ;;  %3585 = vmatpush3.bf16.msra.mxu0 %v3582_v57  ;;  %v3108_v42 = vld [vmem:[%s4130_s1 + $0x60] sm:$0xff] }
 0x9c8   :  { %3431 = vmatprep.subr.mxu0 %v3671_v20 }
 0x9c9   :  { %3422 = vmatpush3.xpose.msk.msra.mxu1 %vm297_vm2, %v1677_v43  ;;  %v3109_v43 = vld [vmem:[%s4130_s1 + $0x68] sm:$0xff] }
 0x9ca   :  { %3426 = vmatprep.subr.mxu1 %v3671_v20  ;;  %3419 = vmatmul.mubr.msk.f32.vlgmr.msra.gmra.mrb[18].mxu0 %vm39_vm0, %v3759_v18 }
 0x9cb   :  { %3433 = vmatprep.mubr.msk.f32.mxu0 %vm3672_vm1, %v3671_v20  ;;  %3432 = vmatpush3.msra.mxu0 %v3102_v9 }
 0x9cc   :  { %3441 = vmatprep.subr.mxu0 %v3671_v20 }
 0xa8d   :  { %v1432_v44 = vpop.f32.mrb[14].mxu0 }
 0xa8e   :  { %v3960_v45 = vadd.f32 %v1505_v37, %v1432_v44  ;;  %v3382_v46 = vpop.f32.mrb[15].mxu0  ;;  %v3586_v44 = vpack.c.bf16 %v3109_v43, %v3108_v42  ;;  %v3141_v43 = vld [vmem:[%s4133_s4] ss:$0 sm:$0xff]  ;;  %s3673_s4 = smov [#allocation2]  }
 0xa8f   :  { %v3110_v46 = vld [vmem:[%s4130_s1 + $0x70] sm:$0xff]  ;;  %s3004_s25 = sshll.u32 %s3673_s4, 4  ;;  %s3005_s25 = int_to_ptr.vmem [resolvable:$true] %s3004_s25 }
 0xa90   :  { %s3647_s26 = scalar_lea.vmem %s3005_s25, 256  ;;  %p3652_p1 = scmp.lt.s32.totalorder %s3005_s25, %s3005_s25 }
 0xa91   :  { %p3648_p0 = scmp.ne.s32.totalorder %s3005_s25, %s3647_s26  ;;  %p3653_p2 = scmp.lt.s32.totalorder %s3647_s26, %s3647_s26 }
 0xa93   :  { %p3654_p3 = por %p3653_p2, %p3652_p1 }
 0xa95   :  { %v3398_v48 = vpop.f32.mrb[16].mxu0  ;;  %p3655_p4 = pnand %p3654_p3, %p3648_p0 }
 0xa96   :  { %v1594_v49 = vadd.f32 %v3398_v48, %v3080_v47  ;;  %v1588_v50 = vpop.f32.mrb[17].mxu0 }
 0xa97   :  { %v1589_v51 = vadd.f32 %v3080_v47, %v1588_v50  ;;  %v3111_v47 = vld [vmem:[%s4130_s1 + $0x78] sm:$0xff] }
 0xa98   :  { %v3590_v48 = vpack.c.bf16 %v3111_v47, %v3110_v46  ;;  %v3119_v50 = vld [vmem:[%s4130_s1 + $0xf8] sm:$0xff] }
 0xa99   :  { %3424 = vmatmul.mubr.msk.f32.vlgmr.msra.gmra.mrb[22].mxu1 %vm297_vm2, %v1589_v51 }
 0xa9a   :  { %3428 = vmatprep.mubr.msk.f32.mxu1 %vm3672_vm1, %v3671_v20 }
 0xa9d   :  { %v3420_v4 = vpop.f32.mrb[18].mxu0 }
 0xa9e   :  { %v1764_v6 = vpop.f32.mrb[19].mxu0  ;;  %v1770_v7 = vadd.f32 %v3420_v4, %v3096_v5  ;;  %v3126_v4 = vld [vmem:[%s4130_s1 + $0x170] sm:$0xff] }
 0xa9f   :  { %v1765_v8 = vadd.f32 %v3096_v5, %v1764_v6  ;;  %v3127_v6 = vld [vmem:[%s4130_s1 + $0x178] sm:$0xff] }
 0xaa1   :  { %3427 = vmatpush3.msra.mxu1 %v1765_v8 }
 0xaa2   :  { %3436 = vmatprep.subr.mxu1 %v3671_v20 }
 0xb6c   :  { %v1845_v58 = vpop.f32.mrb[22].mxu1 }
 0xb6d   :  { %v1846_v59 = vadd.f32 %v1845_v58, %v3797_v36  ;;  %v3425_v60 = vpop.f32.mrb[23].mxu1 }
 0xb6e   :  { %v3121_v60 = vld [vmem:[%s4131_s2 + $0x7] ss:$0 sm:$0xff] }
 0xb6f   :  { %v1849_v61 = vsel %vm297_vm2, %v1846_v59, -inf }
 0xb70   :  { %1850 = vmax.xlane.f32.xlu0 %v1849_v61 }
 0xbfd   :  { %v1851_v62 = vpop.xlane.xlu0 %1850 }
 0xbfe   :  { %v1852_v63 = vsub.f32 %v1846_v59, %v1851_v62 }
 0xc00   :  { %v1853_v0 = vmul.f32 1.442695, %v1852_v63 }
 0xc02   :  { %3631 = vpow2.f32 %v1853_v0 }
 0xc0c   :  { %v3632_v1 = vpop.eup %3631 }
 0xc0d   :  { %v1855_v3 = vsel %vm297_vm2, %v3632_v1, 0.0 }
 0xc0e   :  { %1856 = vadd.xlane.f32.xlu1 %v1855_v3  ;;  %v3125_v3 = vld [vmem:[%s4130_s1 + $0x168] sm:$0xff] }
 0xc9b   :  { %v1857_v10 = vpop.xlane.xlu1 %1856 }
 0xc9c   :  { %3633 = vrcp.f32 %v1857_v10 }
 0xca6   :  { %v3634_v12 = vpop.eup %3633 }
 0xca7   :  { %v1859_v13 = vmul.f32 %v3634_v12, %v1857_v10 }
 0xca9   :  { %v1860_v14 = vsub.f32 2.0, %v1859_v13 }
 0xcab   :  { %v1861_v15 = vmul.f32 %v3634_v12, %v1860_v14 }
 0xcad   :  { %v1862_v16 = vmul.f32 %v3632_v1, %v1861_v15 }
 0xcaf   :  { %3429 = vmatmul.mubr.msk.f32.vlgmr.msra.gmra.mrb[24].mxu1 %vm297_vm2, %v1862_v16 }
 0xcb0   :  { %3437 = vmatpush3.xpose.msk.msra.mxu1 %vm297_vm2, %v1682_v41  ;;  %3438 = vmatprep.mubr.msk.f32.mxu1 %vm3672_vm1, %v3671_v20 }
 0xcb1   :  { %3446 = vmatprep.subr.mxu1 %v3671_v20 }
 0xcb3   :  { %3439 = vmatmul.mubr.msk.f32.vlgmr.msra.gmra.mrb[26].mxu1 %vm297_vm2, %v1594_v49  ;;  %v3118_v49 = vld [vmem:[%s4130_s1 + $0xf0] sm:$0xff] }
 0xcb4   :  { %3447 = vmatpush3.msra.mxu1 %v3102_v9  ;;  %3448 = vmatprep.mubr.msk.f32.mxu1 %vm3672_vm1, %v3671_v20  ;;  %v3598_v51 = vpack.c.bf16 %v3119_v50, %v3118_v49 }
 0xd82   :  { %v1932_v17 = vpop.f32.mrb[24].mxu1 }
 0xd83   :  { %v3430_v19 = vpop.f32.mrb[25].mxu1  ;;  %3434 = vmatmul.mubr.msk.f32.vlgmr.msra.gmra.mrb[20].mxu0 %vm297_vm2, %v1932_v17 }
 0xd84   :  { %3442 = vmatpush3.msra.mxu0 %v1770_v7  ;;  %3443 = vmatprep.mubr.msk.f32.mxu0 %vm3672_vm1, %v3671_v20  ;;  %v3606_v7 = vpack.c.bf16 %v3127_v6, %v3126_v4 }
 0xd85   :  { %3587 = vmatprep.subr.bf16.mxu0 %v3586_v44 }
 0xd86   :  { %v2084_v21 = vpop.f32.mrb[26].mxu1 }
 0xd87   :  { %v2085_v22 = vadd.f32 %v2084_v21, %v3797_v36  ;;  %v3440_v23 = vpop.f32.mrb[27].mxu1 }
 0xd89   :  { %v2088_v25 = vsel %vm297_vm2, %v2085_v22, -inf }
 0xd8a   :  { %2089 = vmax.xlane.f32.xlu0 %v2088_v25  ;;  %v3135_v25 = vld [vmem:[%s4132_s3 + $0x18] sm:$0xff] }
 0xe17   :  { %v2090_v26 = vpop.xlane.xlu0 %2089 }
 0xe18   :  { %v2091_v27 = vsub.f32 %v2085_v22, %v2090_v26 }
 0xe1a   :  { %v2092_v28 = vmul.f32 1.442695, %v2091_v27 }
 0xe1c   :  { %3635 = vpow2.f32 %v2092_v28 }
 0xe26   :  { %v3636_v29 = vpop.eup %3635 }
 0xe27   :  { %v2094_v24 = vsel %vm297_vm2, %v3636_v29, 0.0 }
 0xe28   :  { %2095 = vadd.xlane.f32.xlu1 %v2094_v24 }
 0xe56   :  { %v2007_v30 = vpop.f32.mrb[20].mxu0 }
 0xe57   :  { %v4011_v31 = vadd.f32 %v2007_v30, %v3907_v2  ;;  %v3435_v32 = vpop.f32.mrb[21].mxu0  ;;  %v3117_v2 = vld [vmem:[%s4130_s1 + $0xe8] sm:$0xff] }
 0xe58   :  { %v3594_v41 = vpack.c.bf16 %v3117_v2, %v3116_v40 }
 0xe5a   :  { %3595 = vmatprep.subr.bf16.mxu1 %v3594_v41 }
 0xeb5   :  { %v2096_v33 = vpop.xlane.xlu1 %2095 }
 0xeb6   :  { %3637 = vrcp.f32 %v2096_v33 }
 0xec0   :  { %v3638_v34 = vpop.eup %3637 }
 0xec1   :  { %v2098_v35 = vmul.f32 %v3638_v34, %v2096_v33 }
 0xec3   :  { %v2099_v37 = vsub.f32 2.0, %v2098_v35 }
 0xec5   :  { %v2100_v38 = vmul.f32 %v3638_v34, %v2099_v37 }
 0xec7   :  { %v2101_v39 = vmul.f32 %v3636_v29, %v2100_v38 }
 0xec9   :  { %3444 = vmatmul.mubr.msk.f32.vlgmr.msra.gmra.mrb[22].mxu0 %vm297_vm2, %v2101_v39 }
 0xeca   :  { %3459 = vmatprep.mubr.msk.f32.mxu0 %vm39_vm0, %v3738_v11  ;;  %3589 = vmatpush3.bf16.msra.mxu0 %v3586_v44 }
 0xecb   :  { %3591 = vmatprep.subr.bf16.mxu0 %v3590_v48 }
 0xece   :  { %3593 = vmatpush3.bf16.msra.mxu0 %v3590_v48 }
 0xed1   :  { %3460 = vmatmul.mubr.msk.f32.vlgmr.msra.gmra.mrb[24].mxu0 %vm39_vm0, %v3759_v18 }
 0xed2   :  { %3481 = vmatprep.mubr.msk.f32.mxu0 %vm39_vm0, %v3738_v11 }
 0xf9c   :  { %v2171_v52 = vpop.f32.mrb[22].mxu0 }
 0xf9d   :  { %v3445_v53 = vpop.f32.mrb[23].mxu0  ;;  %3449 = vmatmul.mubr.msk.f32.vlgmr.msra.gmra.mrb[28].mxu1 %vm297_vm2, %v2171_v52 }
 0xf9e   :  { %3597 = vmatpush3.bf16.msra.mxu1 %v3594_v41  ;;  %3470 = vmatprep.mubr.msk.f32.mxu1 %vm39_vm0, %v3738_v11 }
 0xf9f   :  { %3599 = vmatprep.subr.bf16.mxu1 %v3598_v51 }
 0xfa2   :  { %3601 = vmatpush3.bf16.msra.mxu1 %v3598_v51 }
 0xfa3   :  { %3484 = vmatprep.subr.mxu1 %v3671_v20 }
 0xfa4   :  { %v3461_v54 = vpop.f32.mrb[24].mxu0 }
 0xfa5   :  { %3471 = vmatmul.mubr.msk.f32.vlgmr.msra.gmra.mrb[30].mxu1 %vm39_vm0, %v3759_v18  ;;  %v2334_v56 = vadd.f32 %v3461_v54, %v3113_v55  ;;  %v2328_v57 = vpop.f32.mrb[25].mxu0 }
 0xfa6   :  { %3486 = vmatprep.mubr.msk.f32.mxu1 %vm3672_vm1, %v3671_v20  ;;  %v2329_v1 = vadd.f32 %v3113_v55, %v2328_v57 }
0x1070   :  { %v2244_v58 = vpop.f32.mrb[28].mxu1 }
0x1071   :  { %v4056_v11 = vadd.f32 %v2244_v58, %v3960_v45  ;;  %v3450_v59 = vpop.f32.mrb[29].mxu1  ;;  %v3124_v45 = vld [vmem:[%s4130_s1 + $0x160] sm:$0xff] }
0x1072   :  { %v3602_v5 = vpack.c.bf16 %v3125_v3, %v3124_v45 }
0x1074   :  { %3603 = vmatprep.subr.bf16.mxu0 %v3602_v5 }
0x1075   :  { %3605 = vmatpush3.bf16.msra.mxu0 %v3602_v5 }
0x1076   :  { %3607 = vmatprep.subr.bf16.mxu0 %v3606_v7 }
0x1078   :  { %v3472_v61 = vpop.f32.mrb[30].mxu1 }
0x1079   :  { %v2422_v62 = vadd.f32 %v3472_v61, %v3121_v60  ;;  %v2416_v63 = vpop.f32.mrb[31].mxu1  ;;  %3609 = vmatpush3.bf16.msra.mxu0 %v3606_v7 }
0x107a   :  { %v2417_v0 = vadd.f32 %v3121_v60, %v2416_v63  ;;  %3494 = vmatprep.subr.mxu0 %v3671_v20 }
0x107c   :  { %3485 = vmatpush3.xpose.msk.msra.mxu1 %vm297_vm2, %v2417_v0  ;;  %3482 = vmatmul.mubr.msk.f32.vlgmr.msra.gmra.mrb[26].mxu0 %vm39_vm0, %v3759_v18  ;;  %v3129_v18 = vld [vmem:[%s4131_s2 + $0xb] ss:$0 sm:$0xff] }
0x107d   :  { %3489 = vmatprep.subr.mxu1 %v3671_v20  ;;  %3496 = vmatprep.mubr.msk.f32.mxu0 %vm3672_vm1, %v3671_v20 }
0x107e   :  { %3495 = vmatpush3.msra.mxu0 %v3135_v25 }
0x107f   :  { %3487 = vmatmul.mubr.msk.f32.vlgmr.msra.gmra.mrb[32].mxu1 %vm297_vm2, %v2329_v1  ;;  %3504 = vmatprep.subr.mxu0 %v3671_v20 }
0x1080   :  { %3491 = vmatprep.mubr.msk.f32.mxu1 %vm3672_vm1, %v3671_v20 }
0x114f   :  { %v3483_v19 = vpop.f32.mrb[26].mxu0 }
0x1150   :  { %v2504_v21 = vpop.f32.mrb[27].mxu0  ;;  %v2510_v22 = vadd.f32 %v3483_v19, %v3129_v18 }
0x1151   :  { %v2505_v23 = vadd.f32 %v3129_v18, %v2504_v21 }
0x1152   :  { %v2585_v8 = vpop.f32.mrb[32].mxu1 }
0x1153   :  { %v2586_v9 = vadd.f32 %v2585_v8, %v3797_v36  ;;  %v3488_v10 = vpop.f32.mrb[33].mxu1  ;;  %3490 = vmatpush3.msra.mxu1 %v2505_v23 }
0x1154   :  { %3499 = vmatprep.subr.mxu1 %v3671_v20 }
0x1155   :  { %v2589_v12 = vsel %vm297_vm2, %v2586_v9, -inf }
0x1156   :  { %2590 = vmax.xlane.f32.xlu0 %v2589_v12 }
0x11e3   :  { %v2591_v13 = vpop.xlane.xlu0 %2590 }
0x11e4   :  { %v2592_v14 = vsub.f32 %v2586_v9, %v2591_v13 }
0x11e6   :  { %v2593_v15 = vmul.f32 1.442695, %v2592_v14 }
0x11e8   :  { %3639 = vpow2.f32 %v2593_v15 }
0x11f2   :  { %v3640_v16 = vpop.eup %3639 }
0x11f3   :  { %v2595_v17 = vsel %vm297_vm2, %v3640_v16, 0.0 }
0x11f4   :  { %2596 = vadd.xlane.f32.xlu1 %v2595_v17 }
0x1281   :  { %v2597_v26 = vpop.xlane.xlu1 %2596 }
0x1282   :  { %3641 = vrcp.f32 %v2597_v26 }
0x128c   :  { %v3642_v27 = vpop.eup %3641 }
0x128d   :  { %v2599_v28 = vmul.f32 %v3642_v27, %v2597_v26 }
0x128f   :  { %v2600_v29 = vsub.f32 2.0, %v2599_v28 }
0x1291   :  { %v2601_v24 = vmul.f32 %v3642_v27, %v2600_v29 }
0x1293   :  { %v2602_v30 = vmul.f32 %v3640_v16, %v2601_v24 }
0x1295   :  { %3492 = vmatmul.mubr.msk.f32.vlgmr.msra.gmra.mrb[34].mxu1 %vm297_vm2, %v2602_v30 }
0x1296   :  { %3500 = vmatpush3.xpose.msk.msra.mxu1 %vm297_vm2, %v2422_v62  ;;  %3501 = vmatprep.mubr.msk.f32.mxu1 %vm3672_vm1, %v3671_v20 }
0x1297   :  { %3509 = vmatprep.subr.mxu1 %v3671_v20 }
0x1299   :  { %3502 = vmatmul.mubr.msk.f32.vlgmr.msra.gmra.mrb[36].mxu1 %vm297_vm2, %v2334_v56 }
0x129a   :  { %3510 = vmatpush3.msra.mxu1 %v3135_v25  ;;  %3511 = vmatprep.mubr.msk.f32.mxu1 %vm3672_vm1, %v3671_v20 }
0x1368   :  { %v2672_v32 = vpop.f32.mrb[34].mxu1 }
0x1369   :  { %v3493_v33 = vpop.f32.mrb[35].mxu1  ;;  %3497 = vmatmul.mubr.msk.f32.vlgmr.msra.gmra.mrb[28].mxu0 %vm297_vm2, %v2672_v32 }
0x136a   :  { %3505 = vmatpush3.msra.mxu0 %v2510_v22  ;;  %3506 = vmatprep.mubr.msk.f32.mxu0 %vm3672_vm1, %v3671_v20 }
0x136c   :  { %v2824_v34 = vpop.f32.mrb[36].mxu1 }
0x136d   :  { %v2825_v35 = vadd.f32 %v2824_v34, %v3797_v36  ;;  %v3503_v37 = vpop.f32.mrb[37].mxu1 }
0x136f   :  { %v2828_v38 = vsel %vm297_vm2, %v2825_v35, -inf }
0x1370   :  { %2829 = vmax.xlane.f32.xlu0 %v2828_v38 }
0x13fd   :  { %v2830_v39 = vpop.xlane.xlu0 %2829 }
0x13fe   :  { %v2831_v40 = vsub.f32 %v2825_v35, %v2830_v39 }
0x1400   :  { %v2832_v2 = vmul.f32 1.442695, %v2831_v40 }
0x1402   :  { %3643 = vpow2.f32 %v2832_v2 }
0x140c   :  { %v3644_v41 = vpop.eup %3643 }
0x140d   :  { %v2834_v42 = vsel %vm297_vm2, %v3644_v41, 0.0 }
0x140e   :  { %2835 = vadd.xlane.f32.xlu1 %v2834_v42 }
0x143c   :  { %v2747_v20 = vpop.f32.mrb[28].mxu0 }
0x143d   :  { %v2751_v44 = vadd.f32 %v2747_v20, %v4011_v31  ;;  %v3498_v36 = vpop.f32.mrb[29].mxu0 }
0x143f   :  { %v2995_v46 = vadd.f32 %v3141_v43, %v2751_v44 }
0x1441   :  { %2996 = vst.msk [vmem:[#allocation2] sm:$0xff] %vm39_vm0, %v2995_v46 }
0x149b   :  { %v2836_v47 = vpop.xlane.xlu1 %2835 }
0x149c   :  { %3645 = vrcp.f32 %v2836_v47 }
0x14a6   :  { %v3646_v48 = vpop.eup %3645 }
0x14a7   :  { %v2838_v49 = vmul.f32 %v3646_v48, %v2836_v47 }
0x14a9   :  { %v2839_v50 = vsub.f32 2.0, %v2838_v49 }
0x14ab   :  { %v2840_v51 = vmul.f32 %v3646_v48, %v2839_v50 }
0x14ad   :  { %v2841_v52 = vmul.f32 %v3644_v41, %v2840_v51 }
0x14af   :  { %3507 = vmatmul.mubr.msk.f32.vlgmr.msra.gmra.mrb[30].mxu0 %vm297_vm2, %v2841_v52 }
0x1582   :  { %v2911_v53 = vpop.f32.mrb[30].mxu0 }
0x1583   :  { %v3508_v54 = vpop.f32.mrb[31].mxu0  ;;  %3512 = vmatmul.mubr.msk.f32.vlgmr.msra.gmra.mrb[38].mxu1 %vm297_vm2, %v2911_v53 }
0x1656   :  { %v2984_v55 = vpop.f32.mrb[38].mxu1 }
0x1657   :  { %v2988_v31 = vadd.f32 %v2984_v55, %v4056_v11  ;;  %v3513_v56 = vpop.f32.mrb[39].mxu1 }
0x1659   :  { %v2997_v57 = vadd.f32 %v3141_v43, %v2988_v31 }
0x165b   :  { %2998 = vst.msk [vmem:[#allocation2 + $0x8] sm:$0xff] %vm39_vm0, %v2997_v57 }
0x165c   :  { %3658 = shalt.err (!%p3655_p4)
}
0x165d   :  { %s3659_s29 = scalar_lea.hbm %s4135_s6, 256 }
0x165e   :  { %p3660_p5 = scmp.ne.s32.totalorder %s4135_s6, %s3659_s29  ;;  %p3663_p6 = scmp.lt.u32.totalorder %s3659_s29, %s4135_s6 }
0x1660   :  { %p3665_p7 = pnand %p3663_p6, %p3660_p5 }
0x1662   :  { %3668 = shalt.err (!%p3665_p7)
}
0x1663   :  { %s3674_s9 = smov 128   ;;  %s3675_s10 = smov 8  }
0x1664   :  { %3010 = dma.vmem_to_hbm [thread:$0]  %s3005_s25, 256, %s4135_s6, [#allocation3], %s3674_s9, %s3674_s9, %s3675_s10  }
0x1665   :  { %3669 = dma.done.wait [#allocation3], 256  }
0x1666   :  { %3670 = vsyncadd [#allocation3], 4294967040 }
0x1667   :  { %3014 = vsyncpa [#allocation3], 1 }

</bundles_post_ra>
